<compile_context>
chip_gen: v7x
topology: tpu7x:2x2x1
jax: 0.10.0
libtpu: 0.0.40
codegen_flags: <defaults>
</compile_context>

<pallas_src>
import math

import jax
import jax.numpy as jnp
from jax.experimental import pallas as pl
from jax.experimental.pallas import tpu as pltpu

_LANE = 128
_VMEM_TILE_BUDGET = 16 * 1024 * 1024   # sizing budget for pixel tiles (est.)
_VMEM_LIMIT = 32 * 1024 * 1024         # explicit scoped-VMEM limit (safe v5e..v7x)


def _ceil_div(a, b):
    return -(-a // b)


def _mxu_k_target():
    """MXU contraction depth to aim for when packing channel blocks."""
    try:
        kind = jax.devices()[0].device_kind.lower()
    except Exception:
        return 256
    # v2-v5 MXUs are 128-deep; v6e/v7x are 256-deep.
    if any(t in kind for t in ("v2", "v3", "v4", "v5")):
        return 128
    return 256


def _choose_groups(N, C_max, S, k_target):
    """Pick (Gn, G2): images / pixel-groups folded onto the sublane axis."""
    # Gn: whole images (free reshape of NCHW). Largest divisor of N that keeps
    # the packed channel count within the MXU contraction target.
    Gn = 1
    for d in range(N, 0, -1):
        if N % d == 0 and d * C_max <= k_target:
            Gn = d
            break
    # G2: pixel groups (also a free reshape; weight becomes I_Gn ⊗ W ⊗ I_G2).
    # Keep the remaining pixel axis lane-dense (>= 128 lanes).
    G2 = 1
    while (S % (2 * G2) == 0
           and Gn * C_max * (2 * G2) <= k_target
           and S // (2 * G2) >= _LANE):
        G2 *= 2
    return Gn, G2


def _plan_pixel_tiles(P2, n_batch_groups, bytes_per_pixel, fixed_bytes):
    """Pick (tile, padded_extent) for the lane/pixel axis from a VMEM budget."""
    p_pad = _ceil_div(P2, _LANE) * _LANE
    cap = max(_VMEM_TILE_BUDGET - fixed_bytes, _LANE * bytes_per_pixel)
    tp_cap = max(_LANE, min(32768, (cap // bytes_per_pixel) // _LANE * _LANE))
    n_tiles = max(1, _ceil_div(p_pad, tp_cap))
    # v7x has 2 TensorCores; with "parallel" semantics an even, >=2-step grid
    # load-balances them. Only split when there is enough work to amortize the
    # ~0.35us/step pipeline overhead.
    if n_batch_groups % 2 == 1:
        if n_tiles == 1 and p_pad >= 8 * _LANE:
            n_tiles = 2
        elif n_tiles > 1 and n_tiles % 2 == 1:
            n_tiles += 1
    tp = _ceil_div(_ceil_div(p_pad, n_tiles), _LANE) * _LANE
    return tp, n_tiles * tp


def ffn_forward(x, weights, biases, alphas):
    """Forward pass of FFN: [Conv2d(1x1) -> PReLU] * L.

    x       : (N, C0, H, W) float32, NCHW (matches PyTorch).
    weights : list of (d_{i+1}, d_i) 1x1-conv weight matrices.
    biases  : list of (d_{i+1},) bias vectors.
    alphas  : list of Python-float PReLU slopes (compile-time constants).
              # TODO(synk): if alphas must stay traced (learnable) parameters,
              # feed them via SMEM scalar prefetch instead of closing over floats.
    """
    N, C0, H, W = x.shape
    L = len(weights)
    assert L == len(biases) == len(alphas)
    assert weights[0].shape[1] == C0
    C_out = weights[-1].shape[0]
    S = H * W

    dims = [C0] + [int(w.shape[0]) for w in weights]
    C_max = max(dims)
    alphas = [float(a) for a in alphas]

    # ---- block-diagonal packing factors ------------------------------------
    Gn, G2 = _choose_groups(N, C_max, S, _mxu_k_target())
    B = N // Gn                      # batch-group grid axis
    P2 = S // G2                     # pixels per group (lane axis)
    rows = [Gn * G2 * d for d in dims]   # packed channel rows per layer boundary

    # ---- packed parameters (built once, wrapper side; tiny) ----------------
    eye_gn = jnp.eye(Gn, dtype=x.dtype)
    eye_g2 = jnp.eye(G2, dtype=x.dtype)
    w_packed, b_packed = [], []
    for Wm, b in zip(weights, biases):
        Wm = jnp.asarray(Wm, x.dtype)
        b = jnp.asarray(b, x.dtype)
        w_packed.append(jnp.kron(jnp.kron(eye_gn, Wm), eye_g2))   # I_Gn ⊗ W ⊗ I_G2
        b_packed.append(jnp.broadcast_to(
            b[None, :, None], (Gn, b.shape[0], G2)).reshape(-1, 1))

    # ---- activation slab: free row-major reshape of NCHW -------------------
    #   (N, C0, H, W) -> (B, Gn*C0*G2, S/G2)   (no transpose, no HBM copy)
    x_slab = x.reshape(B, rows[0], P2)

    # ---- pixel tiling from a VMEM budget ------------------------------------
    fixed = 8 * sum(wp.size + bp.size for wp, bp in zip(w_packed, b_packed))
    per_px = 4 * (2 * rows[0] + 2 * rows[-1] + 3 * max(rows))
    TP, P_pad = _plan_pixel_tiles(P2, B, per_px, fixed)
    if P_pad != P2:
        # Zero-pad to lane-dense multiple of the tile; sliced off at the end.
        x_slab = jnp.pad(x_slab, ((0, 0), (0, 0), (0, P_pad - P2)))
    grid = (B, P_pad // TP)

    # ---- fused kernel: whole layer chain, intermediates never touch HBM ----
    def kernel(*refs):
        # refs = (x_ref, w0, b0, w1, b1, ..., o_ref)
        x_ref, o_ref = refs[0], refs[-1]
        h = x_ref[0].astype(jnp.float32)                       # (rows[0], TP)
        for i in range(L):
            w = refs[1 + 2 * i][...].astype(jnp.float32)       # (rows[i+1], rows[i])
            b = refs[2 + 2 * i][...].astype(jnp.float32)       # (rows[i+1], 1)
            # 1x1 conv (block-diag packed) == MXU matmul over channels.
            # Explicit f32 contraction precision (deliberate: DMA-bound kernel,
            # keeps PyTorch f32 numerics).
            h = jnp.dot(w, h, preferred_element_type=jnp.float32,
                        precision=jax.lax.Precision.HIGHEST) + b
            a = alphas[i]                                      # compile-time const
            h = jnp.where(h >= 0.0, h, a * h)                  # PReLU (VPU select)
        o_ref[0] = h.astype(o_ref.dtype)

    in_specs = [pl.BlockSpec((1, rows[0], TP), lambda bg, p: (bg, 0, p))]
    for wp, bp in zip(w_packed, b_packed):
        in_specs.append(pl.BlockSpec(wp.shape, lambda bg, p: (0, 0)))
        in_specs.append(pl.BlockSpec(bp.shape, lambda bg, p: (0, 0)))
    flat_params = [a for pair in zip(w_packed, b_packed) for a in pair]

    out_slab = pl.pallas_call(
        kernel,
        out_shape=jax.ShapeDtypeStruct((B, rows[-1], P_pad), x.dtype),
        grid_spec=pltpu.PrefetchScalarGridSpec(
            num_scalar_prefetch=0,
            grid=grid,
            in_specs=in_specs,
            out_specs=pl.BlockSpec((1, rows[-1], TP), lambda bg, p: (bg, 0, p)),
        ),
        compiler_params=pltpu.CompilerParams(
            dimension_semantics=("parallel", "parallel"),
            vmem_limit_bytes=_VMEM_LIMIT,
        ),
    )(x_slab, *flat_params)

    # ---- back to NCHW: slice off pixel padding, then a free reshape ---------
    out = out_slab[:, :, :P2] if P_pad != P2 else out_slab
    return out.reshape(N, C_out, H, W)


def _reference(x, weights, biases, alphas):
    """Pure-JAX reference: 1x1 conv (einsum over channels) + PReLU per layer."""
    h = x
    for Wm, b, a in zip(weights, biases, alphas):
        h = jnp.einsum("oc,nchw->nohw", Wm, h,
                       precision=jax.lax.Precision.HIGHEST) + b[None, :, None, None]
        h = jnp.where(h >= 0.0, h, a * h)
    return h


if __name__ == "__main__":
    # FFN(dims) with dims = (4, 32, 32, 4): 3 layers of Conv2d(1x1) + PReLU.
    dims = (4, 32, 32, 4)
    L = len(dims) - 1
    N, H, W = 2, 16, 16          # S = 256 pixels; packed rows up to 128, lane dim 128

    key = jax.random.PRNGKey(0)
    keys = jax.random.split(key, 2 * L + 1)
    x = jax.random.normal(keys[0], (N, dims[0], H, W), dtype=jnp.float32)

    # Deterministic "parameter init" (uniform +-1/sqrt(fan_in), like Conv2d).
    weights, biases = [], []
    for i in range(L):
        bound = 1.0 / math.sqrt(dims[i])
        weights.append(jax.random.uniform(
            keys[1 + 2 * i], (dims[i + 1], dims[i]), jnp.float32, -bound, bound))
        biases.append(jax.random.uniform(
            keys[2 + 2 * i], (dims[i + 1],), jnp.float32, -bound, bound))
    alphas = [0.25] * L          # nn.PReLU() default init value

    out = jax.block_until_ready(ffn_forward(x, weights, biases, alphas))
    ref = _reference(x, weights, biases, alphas)

    assert out.shape == (N, dims[-1], H, W)
    err = float(jnp.max(jnp.abs(out - ref)))
    assert jnp.allclose(out, ref, atol=1e-4, rtol=1e-4), err

    print("KERNEL_OK")
</pallas_src>

<mosaic_0001>
module attributes {stable_mosaic.version = 11 : i64} {
  func.func @kernel(%arg0: i32, %arg1: i32, %arg2: memref<1x16x128xf32, #tpu.memory_space<vmem>>, %arg3: memref<128x16xf32, #tpu.memory_space<vmem>>, %arg4: memref<128x1xf32, #tpu.memory_space<vmem>>, %arg5: memref<128x128xf32, #tpu.memory_space<vmem>>, %arg6: memref<128x1xf32, #tpu.memory_space<vmem>>, %arg7: memref<16x128xf32, #tpu.memory_space<vmem>>, %arg8: memref<16x1xf32, #tpu.memory_space<vmem>>, %arg9: memref<1x16x128xf32, #tpu.memory_space<vmem>>) attributes {dimension_semantics = [#tpu.dimension_semantics<parallel>, #tpu.dimension_semantics<parallel>], iteration_bounds = array<i64: 1, 1>, scalar_prefetch = 0 : i64, scratch_operands = 0 : i64, tpu.core_type = #tpu.core_type<tc>, window_params = [{transform_indices = @transform_0, window_bounds = array<i64: 1, 16, 128>}, {pipeline_mode = #tpu.pipeline_mode<synchronous>, transform_indices = @transform_1, window_bounds = array<i64: 128, 16>}, {pipeline_mode = #tpu.pipeline_mode<synchronous>, transform_indices = @transform_2, window_bounds = array<i64: 128, 1>}, {pipeline_mode = #tpu.pipeline_mode<synchronous>, transform_indices = @transform_3, window_bounds = array<i64: 128, 128>}, {pipeline_mode = #tpu.pipeline_mode<synchronous>, transform_indices = @transform_4, window_bounds = array<i64: 128, 1>}, {pipeline_mode = #tpu.pipeline_mode<synchronous>, transform_indices = @transform_5, window_bounds = array<i64: 16, 128>}, {pipeline_mode = #tpu.pipeline_mode<synchronous>, transform_indices = @transform_6, window_bounds = array<i64: 16, 1>}, {transform_indices = @transform_7, window_bounds = array<i64: 1, 16, 128>}]} {
    %c0 = arith.constant 0 : index
    %c0_0 = arith.constant 0 : index
    %c0_1 = arith.constant 0 : index
    %0 = vector.load %arg2[%c0, %c0_0, %c0_1] : memref<1x16x128xf32, #tpu.memory_space<vmem>>, vector<1x16x128xf32>
    %1 = vector.shape_cast %0 : vector<1x16x128xf32> to vector<16x128xf32>
    %c0_2 = arith.constant 0 : index
    %c0_3 = arith.constant 0 : index
    %2 = vector.load %arg3[%c0_2, %c0_3] : memref<128x16xf32, #tpu.memory_space<vmem>>, vector<128x16xf32>
    %c0_4 = arith.constant 0 : index
    %c0_5 = arith.constant 0 : index
    %3 = vector.load %arg4[%c0_4, %c0_5] : memref<128x1xf32, #tpu.memory_space<vmem>>, vector<128x1xf32>
    %cst = arith.constant dense<0.000000e+00> : vector<128x128xf32>
    %4 = tpu.matmul %2, %1, %cst {dimension_numbers = #tpu.dot_dimension_numbers<[1], [0], [0], [1], [0, 0, 1, 1], [], []>, precision = #tpu.contract_precision<fp32>} : vector<128x16xf32>, vector<16x128xf32>, vector<128x128xf32> -> vector<128x128xf32>
    %5 = vector.broadcast %3 : vector<128x1xf32> to vector<128x128xf32>
    %6 = arith.addf %4, %5 : vector<128x128xf32>
    %cst_6 = arith.constant 0.000000e+00 : f32
    %7 = vector.broadcast %cst_6 : f32 to vector<128x128xf32>
    %8 = arith.cmpf oge, %6, %7 : vector<128x128xf32>
    %cst_7 = arith.constant 2.500000e-01 : f32
    %9 = vector.broadcast %cst_7 : f32 to vector<128x128xf32>
    %10 = arith.mulf %9, %6 : vector<128x128xf32>
    %11 = arith.select %8, %6, %10 : vector<128x128xi1>, vector<128x128xf32>
    %c0_8 = arith.constant 0 : index
    %c0_9 = arith.constant 0 : index
    %12 = vector.load %arg5[%c0_8, %c0_9] : memref<128x128xf32, #tpu.memory_space<vmem>>, vector<128x128xf32>
    %c0_10 = arith.constant 0 : index
    %c0_11 = arith.constant 0 : index
    %13 = vector.load %arg6[%c0_10, %c0_11] : memref<128x1xf32, #tpu.memory_space<vmem>>, vector<128x1xf32>
    %cst_12 = arith.constant dense<0.000000e+00> : vector<128x128xf32>
    %14 = tpu.matmul %12, %11, %cst_12 {dimension_numbers = #tpu.dot_dimension_numbers<[1], [0], [0], [1], [0, 0, 1, 1], [], []>, precision = #tpu.contract_precision<fp32>} : vector<128x128xf32>, vector<128x128xf32>, vector<128x128xf32> -> vector<128x128xf32>
    %15 = vector.broadcast %13 : vector<128x1xf32> to vector<128x128xf32>
    %16 = arith.addf %14, %15 : vector<128x128xf32>
    %cst_13 = arith.constant 0.000000e+00 : f32
    %17 = vector.broadcast %cst_13 : f32 to vector<128x128xf32>
    %18 = arith.cmpf oge, %16, %17 : vector<128x128xf32>
    %cst_14 = arith.constant 2.500000e-01 : f32
    %19 = vector.broadcast %cst_14 : f32 to vector<128x128xf32>
    %20 = arith.mulf %19, %16 : vector<128x128xf32>
    %21 = arith.select %18, %16, %20 : vector<128x128xi1>, vector<128x128xf32>
    %c0_15 = arith.constant 0 : index
    %c0_16 = arith.constant 0 : index
    %22 = vector.load %arg7[%c0_15, %c0_16] : memref<16x128xf32, #tpu.memory_space<vmem>>, vector<16x128xf32>
    %c0_17 = arith.constant 0 : index
    %c0_18 = arith.constant 0 : index
    %23 = vector.load %arg8[%c0_17, %c0_18] : memref<16x1xf32, #tpu.memory_space<vmem>>, vector<16x1xf32>
    %cst_19 = arith.constant dense<0.000000e+00> : vector<16x128xf32>
    %24 = tpu.matmul %22, %21, %cst_19 {dimension_numbers = #tpu.dot_dimension_numbers<[1], [0], [0], [1], [0, 0, 1, 1], [], []>, precision = #tpu.contract_precision<fp32>} : vector<16x128xf32>, vector<128x128xf32>, vector<16x128xf32> -> vector<16x128xf32>
    %25 = vector.broadcast %23 : vector<16x1xf32> to vector<16x128xf32>
    %26 = arith.addf %24, %25 : vector<16x128xf32>
    %cst_20 = arith.constant 0.000000e+00 : f32
    %27 = vector.broadcast %cst_20 : f32 to vector<16x128xf32>
    %28 = arith.cmpf oge, %26, %27 : vector<16x128xf32>
    %cst_21 = arith.constant 2.500000e-01 : f32
    %29 = vector.broadcast %cst_21 : f32 to vector<16x128xf32>
    %30 = arith.mulf %29, %26 : vector<16x128xf32>
    %31 = arith.select %28, %26, %30 : vector<16x128xi1>, vector<16x128xf32>
    %c0_22 = arith.constant 0 : index
    %c0_23 = arith.constant 0 : index
    %c0_24 = arith.constant 0 : index
    %32 = vector.load %arg9[%c0_22, %c0_23, %c0_24] : memref<1x16x128xf32, #tpu.memory_space<vmem>>, vector<1x16x128xf32>
    %33 = vector.shape_cast %32 : vector<1x16x128xf32> to vector<16x128xf32>
    %34 = vector.shape_cast %31 : vector<16x128xf32> to vector<1x16x128xf32>
    tpu.vector_store %arg9[%c0_22, %c0_23, %c0_24], %34 {strides = array<i32>} : memref<1x16x128xf32, #tpu.memory_space<vmem>>, vector<1x16x128xf32>,
    return
  }
  func.func @transform_0(%arg0: i32, %arg1: i32) -> (i32, i32, i32) {
    %c0_i32 = arith.constant 0 : i32
    %c0_i32_0 = arith.constant 0 : i32
    return %arg0, %c0_i32, %arg1 : i32, i32, i32
  }
  func.func @transform_1(%arg0: i32, %arg1: i32) -> (i32, i32) {
    %c0_i32 = arith.constant 0 : i32
    %c0_i32_0 = arith.constant 0 : i32
    %c0_i32_1 = arith.constant 0 : i32
    return %c0_i32, %c0_i32_0 : i32, i32
  }
  func.func @transform_2(%arg0: i32, %arg1: i32) -> (i32, i32) {
    %c0_i32 = arith.constant 0 : i32
    %c0_i32_0 = arith.constant 0 : i32
    %c0_i32_1 = arith.constant 0 : i32
    return %c0_i32, %c0_i32_0 : i32, i32
  }
  func.func @transform_3(%arg0: i32, %arg1: i32) -> (i32, i32) {
    %c0_i32 = arith.constant 0 : i32
    %c0_i32_0 = arith.constant 0 : i32
    %c0_i32_1 = arith.constant 0 : i32
    return %c0_i32, %c0_i32_0 : i32, i32
  }
  func.func @transform_4(%arg0: i32, %arg1: i32) -> (i32, i32) {
    %c0_i32 = arith.constant 0 : i32
    %c0_i32_0 = arith.constant 0 : i32
    %c0_i32_1 = arith.constant 0 : i32
    return %c0_i32, %c0_i32_0 : i32, i32
  }
  func.func @transform_5(%arg0: i32, %arg1: i32) -> (i32, i32) {
    %c0_i32 = arith.constant 0 : i32
    %c0_i32_0 = arith.constant 0 : i32
    %c0_i32_1 = arith.constant 0 : i32
    return %c0_i32, %c0_i32_0 : i32, i32
  }
  func.func @transform_6(%arg0: i32, %arg1: i32) -> (i32, i32) {
    %c0_i32 = arith.constant 0 : i32
    %c0_i32_0 = arith.constant 0 : i32
    %c0_i32_1 = arith.constant 0 : i32
    return %c0_i32, %c0_i32_0 : i32, i32
  }
  func.func @transform_7(%arg0: i32, %arg1: i32) -> (i32, i32, i32) {
    %c0_i32 = arith.constant 0 : i32
    %c0_i32_0 = arith.constant 0 : i32
    return %arg0, %c0_i32, %arg1 : i32, i32, i32
  }
}

</mosaic_0001>

<bundles_post_ra>
// kernel: tpu_custom_call.1
= control target key start
LH: loop header
LB: loop body
LE: loop exit
PB: predicated region body
PF: predicated region fallthrough
CT: control target
= control target key end

     0   :  { %vm141_vm0 = vcmask 130048   ;;  %v5274_v9 = vmov 0   ;;  %s6643_s0 = inlined_call_operand.vmem [shape: f32[1,16,128], index: 0, kind: input, shape index: {}]   ;;  %s6644_s1 = inlined_call_operand.vmem [shape: f32[128,16], index: 1, kind: input, shape index: {}]   ;;  %s6645_s2 = inlined_call_operand.vmem [shape: f32[128,1], index: 2, kind: input, shape index: {}]   ;;  %s6646_s3 = inlined_call_operand.vmem [shape: f32[128,128], index: 3, kind: input, shape index: {}]   ;;  %s6647_s4 = inlined_call_operand.vmem [shape: f32[128,1], index: 4, kind: input, shape index: {}]   ;;  %s6648_s5 = inlined_call_operand.vmem [shape: f32[16,128], index: 5, kind: input, shape index: {}]   ;;  %s6649_s6 = inlined_call_operand.vmem [shape: f32[16,1], index: 6, kind: input, shape index: {}]   ;;  %s6650_s7 = inlined_call_operand.hbm [shape: f32[1,16,128], index: 7, kind: output, shape index: {}]  }
   0x1   :  { %v27_v0 = vld [vmem:[%s6643_s0] sm:$0xff]  ;;  %v28_v1 = vld [vmem:[%s6643_s0 + $0x8] sm:$0xff]  ;;  %v31_v7 = vld [vmem:[%s6644_s1 + $0x10] sm:$0xff]  ;;  %5248 = vset.pattern.permute.xlu0 %v5274_v9  ;;  %5249 = vset.pattern.permute.xlu1 %v5274_v9 }
   0x2   :  { %v29_v2 = vld [vmem:[%s6644_s1] sm:$0xff]  ;;  %v191_v3 = vand.u32 4294901760, %v27_v0  ;;  %v194_v4 = vand.u32 4294901760, %v28_v1  ;;  %v30_v6 = vld [vmem:[%s6644_s1 + $0x8] sm:$0xff]  ;;  %v32_v8 = vld [vmem:[%s6644_s1 + $0x18] sm:$0xff]  ;;  %v149_v12 = vsel %vm141_vm0, %v31_v7, 0 }
   0x3   :  { %v143_v5 = vsel %vm141_vm0, %v29_v2, 0  ;;  %v146_v11 = vsel %vm141_vm0, %v30_v6, 0  ;;  %v33_v13 = vld [vmem:[%s6644_s1 + $0x20] sm:$0xff]  ;;  %v34_v18 = vld [vmem:[%s6644_s1 + $0x28] sm:$0xff]  ;;  %v5358_v20 = vand.u32 4294901760, %v149_v12  ;;  %v152_v21 = vsel %vm141_vm0, %v32_v8, 0 }
   0x4   :  { %v5337_v10 = vand.u32 4294901760, %v143_v5  ;;  %v5344_v14 = vpack.c.bf16 %v194_v4, %v191_v3  ;;  %v5346_v15 = vsub.f32 %v27_v0, %v191_v3  ;;  %v5348_v16 = vsub.f32 %v28_v1, %v194_v4  ;;  %v35_v22 = vld [vmem:[%s6644_s1 + $0x30] sm:$0xff]  ;;  %v36_v25 = vld [vmem:[%s6644_s1 + $0x38] sm:$0xff]  ;;  %v45_v27 = vld [vmem:[%s6645_s2] sm:$0xff] }
   0x5   :  { %v5350_v17 = vand.u32 4294901760, %v146_v11  ;;  %v155_v24 = vsel %vm141_vm0, %v33_v13, 0  ;;  %v158_v26 = vsel %vm141_vm0, %v34_v18, 0  ;;  %v47_v28 = vld [vmem:[%s6645_s2 + $0x10] sm:$0xff]  ;;  %v5383_v30 = vand.u32 4294901760, %v152_v21  ;;  %63 = vperm.xlu0 %5248, %v45_v27   ;;  %v37_v35 = vld [vmem:[%s6644_s1 + $0x40] sm:$0xff] }
   0x6   :  { %v5356_v19 = vsub.f32 %v143_v5, %v5337_v10  ;;  %v4640_v23 = vpack.c.bf16 %v5348_v16, %v5346_v15  ;;  %4633 = vmatprep.subr.bf16.mxu1 %v5344_v14  ;;  %v161_v31 = vsel %vm141_vm0, %v35_v22, 0  ;;  %v5387_v32 = vsub.f32 %v149_v12, %v5358_v20  ;;  %v38_v36 = vld [vmem:[%s6644_s1 + $0x48] sm:$0xff]  ;;  %73 = vperm.xlu1 %5249, %v47_v28   ;;  %v48_v40 = vld [vmem:[%s6645_s2 + $0x18] sm:$0xff]  ;;  %v39_v46 = vld [vmem:[%s6644_s1 + $0x50] sm:$0xff] }
   0x7   :  { %4635 = vmatpush3.bf16.msra.mxu1 %v5344_v14  ;;  %v5381_v29 = vsub.f32 %v146_v11, %v5350_v17  ;;  %v5389_v33 = vand.u32 4294901760, %v155_v24  ;;  %v164_v34 = vsel %vm141_vm0, %v36_v25, 0  ;;  %v46_v37 = vld [vmem:[%s6645_s2 + $0x8] sm:$0xff]  ;;  %v5402_v38 = vand.u32 4294901760, %v158_v26  ;;  %v49_v47 = vld [vmem:[%s6645_s2 + $0x20] sm:$0xff]  ;;  %v40_v60 = vld [vmem:[%s6644_s1 + $0x58] sm:$0xff] }
   0x8   :  { %3978 = vmatprep.mubr.f32.mxu0 %v5356_v19  ;;  %4641 = vmatprep.subr.bf16.mxu0 %v4640_v23  ;;  %v5404_v39 = vand.u32 4294901760, %v161_v31  ;;  %v5411_v41 = vsub.f32 %v152_v21, %v5383_v30  ;;  %v5413_v42 = vand.u32 4294901760, %v164_v34  ;;  %v167_v43 = vsel %vm141_vm0, %v37_v35, 0  ;;  %v50_v55 = vld [vmem:[%s6645_s2 + $0x28] sm:$0xff]  ;;  %v41_v1 = vld [vmem:[%s6644_s1 + $0x60] sm:$0xff] }
   0x9   :  { %4643 = vmatpush3.bf16.msra.mxu0 %v4640_v23  ;;  %v170_v44 = vsel %vm141_vm0, %v38_v36, 0  ;;  %68 = vperm.xlu0 %5248, %v46_v37   ;;  %v5420_v45 = vsub.f32 %v155_v24, %v5389_v33  ;;  %v5429_v48 = vsub.f32 %v158_v26, %v5402_v38  ;;  %v259_v49 = vand.u32 4294901760, %v5356_v19 }
   0xa   :  { %4645 = vmatprep.subr.bf16.mxu0 %v5344_v14  ;;  %v269_v50 = vand.u32 4294901760, %v5381_v29  ;;  %78 = vperm.xlu1 %5249, %v48_v40   ;;  %v5434_v51 = vsub.f32 %v161_v31, %v5404_v39  ;;  %v5436_v52 = vand.u32 4294901760, %v167_v43  ;;  %v5438_v53 = vand.u32 4294901760, %v170_v44 }
   0xb   :  { %v279_v54 = vand.u32 4294901760, %v5387_v32  ;;  %v5446_v56 = vsub.f32 %v164_v34, %v5413_v42  ;;  %v173_v57 = vsel %vm141_vm0, %v39_v46, 0  ;;  %v260_v58 = vsub.f32 %v5356_v19, %v259_v49 }
   0xc   :  { %3979 = vmatmul.mubr.f32.vlgmr.msra.gmra.mrb[0].mxu0 %v5381_v29  ;;  %v270_v59 = vsub.f32 %v5381_v29, %v269_v50  ;;  %v420_v62 = vand.u32 4294901760, %v5346_v15  ;;  %v427_v63 = vand.u32 4294901760, %v5348_v16  ;;  %v289_v0 = vand.u32 4294901760, %v5411_v41 }
   0xd   :  { %4647 = vmatpush3.bf16.msra.mxu0 %v5344_v14  ;;  %3981 = vmatprep.mubr.f32.mxu0 %v5387_v32  ;;  %v280_v61 = vsub.f32 %v5387_v32, %v279_v54  ;;  %v261_v2 = vand.u32 4294901760, %v260_v58  ;;  %v299_v4 = vand.u32 4294901760, %v5420_v45  ;;  %v309_v5 = vand.u32 4294901760, %v5429_v48 }
   0xe   :  { %83 = vperm.xlu0 %5248, %v49_v47   ;;  %v271_v3 = vand.u32 4294901760, %v270_v59  ;;  %88 = vperm.xlu1 %5249, %v50_v55   ;;  %v5470_v7 = vpack.c.bf16 %v427_v63, %v420_v62  ;;  %v290_v8 = vsub.f32 %v5411_v41, %v289_v0  ;;  %v319_v9 = vand.u32 4294901760, %v5434_v51 }
   0xf   :  { %v281_v6 = vand.u32 4294901760, %v280_v61 }
  0x10   :  { %3982 = vmatmul.mubr.f32.gmra.mrb[2].mxu0 %v5411_v41 }
  0x11   :  { %3984 = vmatprep.mubr.f32.mxu0 %v5420_v45 }
  0x12   :  { %12 = vsyncpa [#allocation3], 0  ;;  %v5478_v11 = vsub.f32 %v167_v43, %v5436_v52  ;;  %v5480_v12 = vand.u32 4294901760, %v173_v57  ;;  %v176_v13 = vsel %vm141_vm0, %v40_v60, 0  ;;  %3922 = vmatprep.mubr.f32.mxu1 %v261_v2  ;;  %v300_v18 = vsub.f32 %v5420_v45, %v299_v4  ;;  %v51_v21 = vld [vmem:[%s6645_s2 + $0x30] sm:$0xff]  ;;  %v52_v22 = vld [vmem:[%s6645_s2 + $0x38] sm:$0xff]  ;;  %4649 = vmatprep.subr.bf16.mxu0 %v5470_v7 }
  0x13   :  { %v179_v23 = vsel %vm141_vm0, %v41_v1, 0  ;;  %v42_v24 = vld [vmem:[%s6644_s1 + $0x68] sm:$0xff]  ;;  %3923 = vmatmul.mubr.f32.vlgmr.msra.gmra.mrb[0].mxu1 %v271_v3  ;;  %v291_v25 = vand.u32 4294901760, %v290_v8  ;;  %v310_v26 = vsub.f32 %v5429_v48, %v309_v5  ;;  %v329_v27 = vand.u32 4294901760, %v5446_v56  ;;  %v43_v28 = vld [vmem:[%s6644_s1 + $0x70] sm:$0xff]  ;;  %93 = vperm.xlu0 %5248, %v51_v21   ;;  %v53_v47 = vld [vmem:[%s6645_s2 + $0x40] sm:$0xff] }
  0x14   :  { %3985 = vmatmul.mubr.f32.gmra.mrb[4].mxu0 %v5429_v48  ;;  %3925 = vmatprep.mubr.f32.mxu1 %v281_v6  ;;  %v301_v31 = vand.u32 4294901760, %v300_v18  ;;  %v320_v34 = vsub.f32 %v5434_v51, %v319_v9  ;;  %v339_v35 = vand.u32 4294901760, %v5478_v11  ;;  %v5510_v36 = vsub.f32 %v170_v44, %v5438_v53  ;;  %v54_v44 = vld [vmem:[%s6645_s2 + $0x48] sm:$0xff]  ;;  %v1360_v19 = vld [vmem:[%s6647_s4 + $0x10] sm:$0xff]  ;;  %v1362_v29 = vld [vmem:[%s6647_s4 + $0x20] sm:$0xff] }
  0x15   :  { %3987 = vmatprep.mubr.f32.mxu0 %v5434_v51  ;;  %v5512_v37 = vand.u32 4294901760, %v176_v13  ;;  %98 = vperm.xlu1 %5249, %v52_v22   ;;  %v5516_v40 = vsub.f32 %v173_v57, %v5480_v12  ;;  %v5518_v43 = vand.u32 4294901760, %v179_v23  ;;  %v182_v46 = vsel %vm141_vm0, %v42_v24, 0  ;;  %v44_v57 = vld [vmem:[%s6644_s1 + $0x78] sm:$0xff]  ;;  %v1363_v32 = vld [vmem:[%s6647_s4 + $0x28] sm:$0xff]  ;;  %v1364_v41 = vld [vmem:[%s6647_s4 + $0x30] sm:$0xff] }
  0x16   :  { %v185_v55 = vsel %vm141_vm0, %v43_v28, 0  ;;  %v311_v58 = vand.u32 4294901760, %v310_v26  ;;  %v330_v59 = vsub.f32 %v5446_v56, %v329_v27  ;;  %v349_v60 = vand.u32 4294901760, %v5510_v36  ;;  %v1365_v45 = vld [vmem:[%s6647_s4 + $0x38] sm:$0xff]  ;;  %v1366_v48 = vld [vmem:[%s6647_s4 + $0x40] sm:$0xff]  ;;  %v1368_v51 = vld [vmem:[%s6647_s4 + $0x50] sm:$0xff] }
  0x17   :  { %3926 = vmatmul.mubr.f32.gmra.mrb[2].mxu1 %v291_v25  ;;  %v321_v61 = vand.u32 4294901760, %v320_v34  ;;  %v340_v1 = vsub.f32 %v5478_v11, %v339_v35  ;;  %v359_v2 = vand.u32 4294901760, %v5516_v40  ;;  %v421_v3 = vsub.f32 %v5346_v15, %v420_v62  ;;  %103 = vperm.xlu0 %5248, %v53_v47   ;;  %v55_v15 = vld [vmem:[%s6645_s2 + $0x50] sm:$0xff] }
  0x18   :  { %3988 = vmatmul.mubr.f32.gmra.mrb[6].mxu0 %v5446_v56  ;;  %3928 = vmatprep.mubr.f32.mxu1 %v301_v31  ;;  %v5542_v6 = vsub.f32 %v176_v13, %v5512_v37  ;;  %v5544_v8 = vand.u32 4294901760, %v182_v46  ;;  %v428_v18 = vsub.f32 %v5348_v16, %v427_v63  ;;  %v5549_v21 = vsub.f32 %v179_v23, %v5518_v43  ;;  %v56_v16 = vld [vmem:[%s6645_s2 + $0x58] sm:$0xff]  ;;  %v1370_v56 = vld [vmem:[%s6647_s4 + $0x60] sm:$0xff] }
  0x19   :  { %3990 = vmatprep.mubr.f32.mxu0 %v5478_v11  ;;  %108 = vperm.xlu1 %5249, %v54_v44   ;;  %v5551_v22 = vand.u32 4294901760, %v185_v55  ;;  %v188_v24 = vsel %vm141_vm0, %v44_v57, 0  ;;  %v422_v25 = vand.u32 4294901760, %v421_v3  ;;  %v331_v62 = vand.u32 4294901760, %v330_v59  ;;  %v57_v57 = vld [vmem:[%s6645_s2 + $0x60] sm:$0xff] }
  0x1a   :  { %v350_v63 = vsub.f32 %v5510_v36, %v349_v60  ;;  %v369_v13 = vand.u32 4294901760, %v5542_v6  ;;  %v429_v23 = vand.u32 4294901760, %v428_v18  ;;  %v341_v26 = vand.u32 4294901760, %v340_v1 }
  0x1b   :  { %3929 = vmatmul.mubr.f32.gmra.mrb[4].mxu1 %v311_v58  ;;  %v360_v28 = vsub.f32 %v5516_v40, %v359_v2  ;;  %v379_v31 = vand.u32 4294901760, %v5549_v21  ;;  %113 = vperm.xlu0 %5248, %v55_v15   ;;  %v5571_v47 = vsub.f32 %v182_v46, %v5544_v8  ;;  %v5573_v44 = vand.u32 4294901760, %v188_v24  ;;  %v58_v46 = vld [vmem:[%s6645_s2 + $0x68] sm:$0xff]  ;;  %v59_v15 = vld [vmem:[%s6645_s2 + $0x70] sm:$0xff] }
  0x1c   :  { %3991 = vmatmul.mubr.f32.gmra.mrb[8].mxu0 %v5510_v36  ;;  %3931 = vmatprep.mubr.f32.mxu1 %v321_v61  ;;  %v4636_v34 = vpack.c.bf16 %v429_v23, %v422_v25  ;;  %v5580_v58 = vsub.f32 %v185_v55, %v5551_v22  ;;  %v351_v59 = vand.u32 4294901760, %v350_v63  ;;  %v370_v61 = vsub.f32 %v5542_v6, %v369_v13 }
  0x1d   :  { %3993 = vmatprep.mubr.f32.mxu0 %v5516_v40  ;;  %118 = vperm.xlu1 %5249, %v56_v16   ;;  %v361_v1 = vand.u32 4294901760, %v360_v28  ;;  %v380_v3 = vsub.f32 %v5549_v21, %v379_v31  ;;  %v389_v18 = vand.u32 4294901760, %v5571_v47  ;;  %v5595_v25 = vsub.f32 %v188_v24, %v5573_v44  ;;  %v1358_v28 = vld [vmem:[%s6647_s4] sm:$0xff] }
  0x1e   :  { %4637 = vmatprep.subr.bf16.mxu1 %v4636_v34  ;;  %v399_v55 = vand.u32 4294901760, %v5580_v58  ;;  %v371_v16 = vand.u32 4294901760, %v370_v61 }
  0x1f   :  { %3932 = vmatmul.mubr.f32.gmra.mrb[6].mxu1 %v331_v62  ;;  %123 = vperm.xlu0 %5248, %v57_v57   ;;  %v60_v62 = vld [vmem:[%s6645_s2 + $0x78] sm:$0xff]  ;;  %v381_v63 = vand.u32 4294901760, %v380_v3  ;;  %v390_v24 = vsub.f32 %v5571_v47, %v389_v18  ;;  %v409_v23 = vand.u32 4294901760, %v5595_v25  ;;  %v1346_v3 = vld [vmem:[%s6646_s3 + $0x20] sm:$0xff] }
  0x20   :  { %3994 = vmatmul.mubr.f32.gmra.mrb[10].mxu0 %v5542_v6  ;;  %3934 = vmatprep.mubr.f32.mxu1 %v341_v26  ;;  %v400_v26 = vsub.f32 %v5580_v58, %v399_v55 }
  0x21   :  { %3996 = vmatprep.mubr.f32.mxu0 %v5549_v21  ;;  %4639 = vmatpush3.bf16.msra.mxu1 %v4636_v34  ;;  %v1359_v34 = vld [vmem:[%s6647_s4 + $0x8] sm:$0xff]  ;;  %v391_v57 = vand.u32 4294901760, %v390_v24 }
  0x22   :  { %128 = vperm.xlu1 %5249, %v58_v46   ;;  %v401_v61 = vand.u32 4294901760, %v400_v26 }
  0x23   :  { %3935 = vmatmul.mubr.f32.gmra.mrb[8].mxu1 %v351_v59  ;;  %133 = vperm.xlu0 %5248, %v59_v15   ;;  %v410_v59 = vsub.f32 %v5595_v25, %v409_v23 }
  0x24   :  { %3997 = vmatmul.mubr.f32.gmra.mrb[12].mxu0 %v5571_v47  ;;  %3937 = vmatprep.mubr.f32.mxu1 %v361_v1  ;;  %v1345_v1 = vld [vmem:[%s6646_s3 + $0x18] sm:$0xff] }
  0x25   :  { %3999 = vmatprep.mubr.f32.mxu0 %v5580_v58  ;;  %v411_v46 = vand.u32 4294901760, %v410_v59  ;;  %v1344_v58 = vld [vmem:[%s6646_s3 + $0x10] sm:$0xff]  ;;  %v1350_v59 = vld [vmem:[%s6646_s3 + $0x40] sm:$0xff] }
  0x26   :  { %138 = vperm.xlu1 %5249, %v60_v62   ;;  %v5828_v15 = vand.u32 4294901760, %v1344_v58  ;;  %v5832_v62 = vand.u32 4294901760, %v1345_v1 }
  0x27   :  { %3938 = vmatmul.mubr.f32.gmra.mrb[10].mxu1 %v371_v16  ;;  %1376 = vperm.xlu0 %5248, %v1358_v28   ;;  %v1349_v28 = vld [vmem:[%s6646_s3 + $0x38] sm:$0xff] }
  0x28   :  { %4000 = vmatmul.mubr.f32.gmra.mrb[14].mxu0 %v5595_v25  ;;  %3940 = vmatprep.mubr.f32.mxu1 %v381_v63  ;;  %v5834_v63 = vand.u32 4294901760, %v1346_v3 }
  0x29   :  { %4006 = vmatprep.mubr.f32.mxu0 %v259_v49  ;;  %v1361_v49 = vld [vmem:[%s6647_s4 + $0x18] sm:$0xff] }
  0x2a   :  { %1381 = vperm.xlu1 %5249, %v1359_v34   ;;  %6719 = vst [vmem:[#allocation6_spill] sm:$0xff] %v5834_v63 }
  0x2b   :  { %3941 = vmatmul.mubr.f32.gmra.mrb[12].mxu1 %v391_v57  ;;  %1386 = vperm.xlu0 %5248, %v1360_v19   ;;  %v5849_v57 = vsub.f32 %v1344_v58, %v5828_v15  ;;  %v5858_v19 = vsub.f32 %v1346_v3, %v5834_v63 }
  0x2c   :  { %4007 = vmatmul.mubr.f32.vlgmr.msra.gmra.mrb[0].mxu0 %v269_v50  ;;  %3943 = vmatprep.mubr.f32.mxu1 %v401_v61  ;;  %v1367_v50 = vld [vmem:[%s6647_s4 + $0x48] sm:$0xff]  ;;  %v5855_v61 = vsub.f32 %v1345_v1, %v5832_v62 }
  0x2d   :  { %4651 = vmatpush3.bf16.msra.mxu0 %v5470_v7  ;;  %4009 = vmatprep.mubr.f32.mxu0 %v279_v54  ;;  %v1369_v54 = vld [vmem:[%s6647_s4 + $0x58] sm:$0xff]  ;;  %v2790_v7 = vld [vmem:[%s6649_s6] sm:$0xff]  ;;  %6723 = vst [vmem:[#allocation10_spill] sm:$0xff] %v5849_v57  ;;  %6725 = vst [vmem:[#allocation12_spill] sm:$0xff] %v5858_v19 }
  0x2e   :  { %4653 = vmatprep.subr.bf16.mxu0 %v5344_v14  ;;  %1391 = vperm.xlu1 %5249, %v1361_v49   ;;  %6724 = vst [vmem:[#allocation11_spill] sm:$0xff] %v5855_v61 }
  0x2f   :  { %3944 = vmatmul.mubr.f32.gmra.mrb[14].mxu1 %v411_v46  ;;  %1396 = vperm.xlu0 %5248, %v1362_v29   ;;  %v5863_v46 = vand.u32 4294901760, %v1349_v28 }
  0x30   :  { %4010 = vmatmul.mubr.f32.gmra.mrb[2].mxu0 %v289_v0  ;;  %3950 = vmatprep.mubr.f32.mxu1 %v5337_v10  ;;  %v1371_v0 = vld [vmem:[%s6647_s4 + $0x68] sm:$0xff] }
  0x31   :  { %4012 = vmatprep.mubr.f32.mxu0 %v299_v4  ;;  %v1372_v4 = vld [vmem:[%s6647_s4 + $0x70] sm:$0xff]  ;;  %6727 = vst [vmem:[#allocation14_spill] sm:$0xff] %v5863_v46 }
  0x32   :  { %1401 = vperm.xlu1 %5249, %v1363_v32  }
  0x33   :  { %3951 = vmatmul.mubr.f32.vlgmr.msra.gmra.mrb[0].mxu1 %v5350_v17  ;;  %1406 = vperm.xlu0 %5248, %v1364_v41   ;;  %v5868_v41 = vand.u32 4294901760, %v1350_v59 }
  0x34   :  { %4013 = vmatmul.mubr.f32.gmra.mrb[4].mxu0 %v309_v5  ;;  %3953 = vmatprep.mubr.f32.mxu1 %v5358_v20  ;;  %v1373_v5 = vld [vmem:[%s6647_s4 + $0x78] sm:$0xff] }
  0x35   :  { %4015 = vmatprep.mubr.f32.mxu0 %v319_v9  ;;  %v2791_v9 = vld [vmem:[%s6649_s6 + $0x8] sm:$0xff]  ;;  %6729 = vst [vmem:[#allocation16_spill] sm:$0xff] %v5868_v41 }
  0x36   :  { %1411 = vperm.xlu1 %5249, %v1365_v45   ;;  %v1351_v45 = vld [vmem:[%s6646_s3 + $0x48] sm:$0xff] }
  0x37   :  { %3954 = vmatmul.mubr.f32.gmra.mrb[2].mxu1 %v5383_v30  ;;  %1416 = vperm.xlu0 %5248, %v1366_v48  }
  0x38   :  { %4016 = vmatmul.mubr.f32.gmra.mrb[6].mxu0 %v329_v27  ;;  %3956 = vmatprep.mubr.f32.mxu1 %v5389_v33 }
  0x39   :  { %4018 = vmatprep.mubr.f32.mxu0 %v339_v35 }
  0x3a   :  { %1421 = vperm.xlu1 %5249, %v1367_v50  }
  0x3b   :  { %3957 = vmatmul.mubr.f32.gmra.mrb[4].mxu1 %v5402_v38  ;;  %1426 = vperm.xlu0 %5248, %v1368_v51   ;;  %v6651_v51 = vand.u32 4294901760, %v5849_v57 }
  0x3c   :  { %4019 = vmatmul.mubr.f32.gmra.mrb[8].mxu0 %v349_v60  ;;  %3959 = vmatprep.mubr.f32.mxu1 %v5404_v39 }
  0x3d   :  { %4021 = vmatprep.mubr.f32.mxu0 %v359_v2  ;;  %v5903_v58 = vsub.f32 %v5849_v57, %v6651_v51 }
  0x3e   :  { %1431 = vperm.xlu1 %5249, %v1369_v54   ;;  %v1352_v54 = vld [vmem:[%s6646_s3 + $0x50] sm:$0xff] }
  0x3f   :  { %3960 = vmatmul.mubr.f32.gmra.mrb[6].mxu1 %v5413_v42  ;;  %1436 = vperm.xlu0 %5248, %v1370_v56   ;;  %v6652_v56 = vand.u32 4294901760, %v5855_v61 }
  0x40   :  { %4022 = vmatmul.mubr.f32.gmra.mrb[10].mxu0 %v369_v13  ;;  %3962 = vmatprep.mubr.f32.mxu1 %v5436_v52 }
  0x41   :  { %4024 = vmatprep.mubr.f32.mxu0 %v379_v31  ;;  %v5908_v3 = vsub.f32 %v5855_v61, %v6652_v56 }
  0x42   :  { %1441 = vperm.xlu1 %5249, %v1371_v0   ;;  %v6653_v0 = vand.u32 4294901760, %v5858_v19 }
  0x43   :  { %3963 = vmatmul.mubr.f32.gmra.mrb[8].mxu1 %v5438_v53  ;;  %1446 = vperm.xlu0 %5248, %v1372_v4  }
  0x44   :  { %4025 = vmatmul.mubr.f32.gmra.mrb[12].mxu0 %v389_v18  ;;  %3965 = vmatprep.mubr.f32.mxu1 %v5480_v12  ;;  %v1347_v18 = vld [vmem:[%s6646_s3 + $0x28] sm:$0xff] }
  0x45   :  { %4027 = vmatprep.mubr.f32.mxu0 %v399_v55  ;;  %v1348_v55 = vld [vmem:[%s6646_s3 + $0x30] sm:$0xff]  ;;  %v5836_v24 = vand.u32 4294901760, %v1347_v18 }
  0x46   :  { %1451 = vperm.xlu1 %5249, %v1373_v5   ;;  %v5840_v26 = vand.u32 4294901760, %v1348_v55  ;;  %v5882_v5 = vsub.f32 %v1349_v28, %v5863_v46 }
  0x47   :  { %3966 = vmatmul.mubr.f32.gmra.mrb[10].mxu1 %v5512_v37  ;;  %2794 = vperm.xlu0 %5248, %v2790_v7   ;;  %6720 = vst [vmem:[#allocation7_spill] sm:$0xff] %v5836_v24  ;;  %v5861_v49 = vsub.f32 %v1347_v18, %v5836_v24  ;;  %v5913_v18 = vsub.f32 %v5858_v19, %v6653_v0 }
  0x48   :  { %4028 = vmatmul.mubr.f32.gmra.mrb[14].mxu0 %v409_v23  ;;  %3968 = vmatprep.mubr.f32.mxu1 %v5518_v43  ;;  %6721 = vst [vmem:[#allocation8_spill] sm:$0xff] %v5840_v26  ;;  %v5866_v29 = vsub.f32 %v1348_v55, %v5840_v26  ;;  %6730 = vst [vmem:[#allocation17_spill] sm:$0xff] %v5882_v5 }
  0x49   :  { %4034 = vmatprep.mubr.f32.mxu0 %v5337_v10  ;;  %6726 = vst [vmem:[#allocation13_spill] sm:$0xff] %v5861_v49  ;;  %v6655_v4 = vand.u32 4294901760, %v5861_v49 }
  0x4a   :  { %2799 = vperm.xlu1 %5249, %v2791_v9   ;;  %6728 = vst [vmem:[#allocation15_spill] sm:$0xff] %v5866_v29  ;;  %v6661_v7 = vand.u32 4294901760, %v5866_v29  ;;  %v5885_v9 = vand.u32 4294901760, %v1351_v45 }
  0x4b   :  { %3969 = vmatmul.mubr.f32.gmra.mrb[12].mxu1 %v5544_v8  ;;  %v5918_v55 = vsub.f32 %v5861_v49, %v6655_v4 }
  0x4c   :  { %4035 = vmatmul.mubr.f32.vlgmr.msra.gmra.mrb[0].mxu0 %v5350_v17  ;;  %3971 = vmatprep.mubr.f32.mxu1 %v5551_v22  ;;  %6731 = vst [vmem:[#allocation18_spill] sm:$0xff] %v5885_v9  ;;  %v5927_v56 = vsub.f32 %v5866_v29, %v6661_v7  ;;  %v5930_v0 = vsub.f32 %v1351_v45, %v5885_v9  ;;  %v5945_v7 = vld [vmem:[%s6646_s3 + $0x68] sm:$0xff] }
  0x4d   :  { %4655 = vmatpush3.bf16.msra.mxu0 %v5344_v14  ;;  %4037 = vmatprep.mubr.f32.mxu0 %v5358_v20 }
  0x4f   :  { %3972 = vmatmul.mubr.f32.gmra.mrb[14].mxu1 %v5573_v44 }
  0x50   :  { %4038 = vmatmul.mubr.f32.gmra.mrb[2].mxu0 %v5383_v30 }
  0x51   :  { %4040 = vmatprep.mubr.f32.mxu0 %v5389_v33 }
  0x54   :  { %4041 = vmatmul.mubr.f32.gmra.mrb[4].mxu0 %v5402_v38 }
  0x55   :  { %4043 = vmatprep.mubr.f32.mxu0 %v5404_v39 }
  0x58   :  { %4044 = vmatmul.mubr.f32.gmra.mrb[6].mxu0 %v5413_v42 }
  0x59   :  { %4046 = vmatprep.mubr.f32.mxu0 %v5436_v52 }
  0x5c   :  { %4047 = vmatmul.mubr.f32.gmra.mrb[8].mxu0 %v5438_v53 }
  0x5d   :  { %4049 = vmatprep.mubr.f32.mxu0 %v5480_v12 }
  0x60   :  { %4050 = vmatmul.mubr.f32.gmra.mrb[10].mxu0 %v5512_v37 }
  0x61   :  { %4052 = vmatprep.mubr.f32.mxu0 %v5518_v43 }
  0x64   :  { %4053 = vmatmul.mubr.f32.gmra.mrb[12].mxu0 %v5544_v8 }
  0x65   :  { %4055 = vmatprep.mubr.f32.mxu0 %v5551_v22 }
  0x68   :  { %4056 = vmatmul.mubr.f32.gmra.mrb[14].mxu0 %v5573_v44 }
  0x69   :  { %4062 = vmatprep.mubr.f32.mxu0 %v5337_v10  ;;  %v1342_v10 = vld [vmem:[%s6646_s3] sm:$0xff] }
  0x6a   :  { %v5755_v14 = vand.u32 4294901760, %v1342_v10 }
  0x6c   :  { %4063 = vmatmul.mubr.f32.vlgmr.msra.gmra.mrb[0].mxu0 %v5350_v17  ;;  %v5758_v17 = vsub.f32 %v1342_v10, %v5755_v14  ;;  %v5888_v10 = vsub.f32 %v1350_v59, %v5868_v41  ;;  %v1354_v59 = vld [vmem:[%s6646_s3 + $0x60] sm:$0xff] }
  0x6d   :  { %4065 = vmatprep.mubr.f32.mxu0 %v5358_v20  ;;  %v5940_v19 = vand.u32 4294901760, %v1354_v59 }
  0x6e   :  { %6718 = vst [vmem:[#allocation5_spill] sm:$0xff] %v5758_v17  ;;  %v6656_v20 = vand.u32 4294901760, %v5758_v17  ;;  %6732 = vst [vmem:[#allocation19_spill] sm:$0xff] %v5888_v10 }
  0x6f   :  { %6735 = vst [vmem:[#allocation22_spill] sm:$0xff] %v5940_v19 }
  0x70   :  { %4066 = vmatmul.mubr.f32.gmra.mrb[2].mxu0 %v5383_v30  ;;  %v1538_v30 = vsub.f32 %v5758_v17, %v6656_v20  ;;  %v6737_v17 = vand.u32 4294901760, %v5888_v10 }
  0x71   :  { %4068 = vmatprep.mubr.f32.mxu0 %v5389_v33 }
  0x72   :  { %v1539_v33 = vand.u32 4294901760, %v1538_v30  ;;  %v5890_v30 = vand.u32 4294901760, %v1352_v54 }
  0x74   :  { %4069 = vmatmul.mubr.f32.gmra.mrb[4].mxu0 %v5402_v38  ;;  %4118 = vmatprep.mubr.f32.mxu1 %v1539_v33  ;;  %6733 = vst [vmem:[#allocation20_spill] sm:$0xff] %v5890_v30  ;;  %v1353_v33 = vld [vmem:[%s6646_s3 + $0x58] sm:$0xff]  ;;  %v5936_v20 = vsub.f32 %v1352_v54, %v5890_v30  ;;  %v6736_v54 = vand.u32 4294901760, %v5882_v5 }
  0x75   :  { %4071 = vmatprep.mubr.f32.mxu0 %v5404_v39 }
  0x76   :  { %v5953_v61 = vsub.f32 %v5882_v5, %v6736_v54  ;;  %v5967_v54 = vsub.f32 %v5888_v10, %v6737_v17 }
  0x78   :  { %4072 = vmatmul.mubr.f32.gmra.mrb[6].mxu0 %v5413_v42 }
  0x79   :  { %4074 = vmatprep.mubr.f32.mxu0 %v5436_v52 }
  0x7c   :  { %4075 = vmatmul.mubr.f32.gmra.mrb[8].mxu0 %v5438_v53 }
  0x7d   :  { %4077 = vmatprep.mubr.f32.mxu0 %v5480_v12 }
  0x80   :  { %4078 = vmatmul.mubr.f32.gmra.mrb[10].mxu0 %v5512_v37 }
  0x81   :  { %4080 = vmatprep.mubr.f32.mxu0 %v5518_v43 }
  0x84   :  { %4081 = vmatmul.mubr.f32.gmra.mrb[12].mxu0 %v5544_v8  ;;  %v5786_v40 = vpop.permute.xlu0 %63 }
  0x85   :  { %4083 = vmatprep.mubr.f32.mxu0 %v5551_v22  ;;  %v5784_v37 = vpop.permute.xlu1 %73 }
  0x88   :  { %4084 = vmatmul.mubr.f32.gmra.mrb[14].mxu0 %v5573_v44  ;;  %v5796_v8 = vpop.permute.xlu0 %68  ;;  %v1343_v44 = vld [vmem:[%s6646_s3 + $0x8] sm:$0xff] }
  0x89   :  { %v5792_v2 = vpop.permute.xlu1 %78  ;;  %v5826_v25 = vand.u32 4294901760, %v1343_v44 }
  0x8b   :  { %v5846_v34 = vsub.f32 %v1343_v44, %v5826_v25 }
  0x8d   :  { %v5804_v31 = vpop.permute.xlu1 %88  ;;  %v5806_v47 = vpop.permute.xlu0 %83  ;;  %6722 = vst [vmem:[#allocation9_spill] sm:$0xff] %v5846_v34  ;;  %v6654_v50 = vand.u32 4294901760, %v5846_v34 }
  0x8f   :  { %v5898_v44 = vsub.f32 %v5846_v34, %v6654_v50  ;;  %v5932_v50 = vand.u32 4294901760, %v1353_v33 }
  0x91   :  { %6734 = vst [vmem:[#allocation21_spill] sm:$0xff] %v5932_v50  ;;  %v5960_v34 = vsub.f32 %v1353_v33, %v5932_v50 }
  0x92   :  { %v5838_v23 = vpop.permute.xlu0 %93 }
  0x94   :  { %v5830_v16 = vpop.permute.xlu1 %98 }
  0x96   :  { %v104_v48 = vpop.permute.xlu0 %103 }
  0x98   :  { %v109_v32 = vpop.permute.xlu1 %108 }
  0x9a   :  { %v114_v51 = vpop.permute.xlu0 %113 }
  0x9c   :  { %v119_v1 = vpop.permute.xlu1 %118 }
  0xa1   :  { %v129_v45 = vpop.permute.xlu1 %128 }
 0x106   :  { %v5764_v38 = vpop.f32.mrb[0].mxu1 }
 0x107   :  { %v5766_v39 = vpop.f32.mrb[1].mxu1  ;;  %v5040_v49 = vadd.f32 %v5764_v38, %v5796_v8  ;;  %v5971_v38 = vand.u32 4294901760, %v5945_v7  ;;  %v124_v8 = vpop.permute.xlu0 %123 }
 0x108   :  { %v5042_v29 = vadd.f32 %v5766_v39, %v5786_v40  ;;  %v5978_v40 = vsub.f32 %v1354_v59, %v5940_v19 }
 0x10a   :  { %v5768_v42 = vpop.f32.mrb[2].mxu1 }
 0x10b   :  { %v5770_v52 = vpop.f32.mrb[3].mxu1  ;;  %v5044_v33 = vadd.f32 %v5768_v42, %v5792_v2 }
 0x10c   :  { %v5046_v28 = vadd.f32 %v5770_v52, %v5784_v37 }
 0x10e   :  { %v5772_v53 = vpop.f32.mrb[4].mxu1 }
 0x10f   :  { %v5774_v11 = vpop.f32.mrb[5].mxu1  ;;  %v5048_v17 = vadd.f32 %v5772_v53, %v5804_v31 }
 0x110   :  { %v5050_v5 = vadd.f32 %v5774_v11, %v5806_v47 }
 0x112   :  { %v5776_v12 = vpop.f32.mrb[6].mxu1 }
 0x113   :  { %v5778_v27 = vpop.f32.mrb[7].mxu1  ;;  %v5052_v10 = vadd.f32 %v5776_v12, %v5830_v16 }
 0x114   :  { %v5054_v42 = vadd.f32 %v5778_v27, %v5838_v23  ;;  %v139_v23 = vpop.permute.xlu1 %138 }
 0x116   :  { %v5780_v35 = vpop.f32.mrb[8].mxu1 }
 0x117   :  { %v5782_v36 = vpop.f32.mrb[9].mxu1  ;;  %v5989_v52 = vadd.f32 %v5780_v35, %v109_v32  ;;  %v134_v32 = vpop.permute.xlu0 %133 }
 0x118   :  { %v5992_v2 = vadd.f32 %v5782_v36, %v104_v48 }
 0x11a   :  { %v5788_v43 = vpop.f32.mrb[10].mxu1 }
 0x11b   :  { %v5790_v60 = vpop.f32.mrb[11].mxu1  ;;  %v5995_v53 = vadd.f32 %v5788_v43, %v119_v1 }
 0x11c   :  { %v5998_v12 = vadd.f32 %v5790_v60, %v114_v51 }
 0x11e   :  { %v5794_v6 = vpop.f32.mrb[12].mxu1 }
 0x11f   :  { %v5798_v21 = vpop.f32.mrb[13].mxu1  ;;  %v6001_v47 = vadd.f32 %v5794_v6, %v129_v45 }
 0x122   :  { %v5800_v22 = vpop.f32.mrb[14].mxu1 }
 0x123   :  { %v5802_v13 = vpop.f32.mrb[15].mxu1  ;;  %v6007_v48 = vadd.f32 %v5800_v22, %v139_v23 }
 0x124   :  { %v6010_v6 = vadd.f32 %v5802_v13, %v134_v32 }
 0x13f   :  { %v4064_v4 = vpop.f32.mrb[0].mxu0 }
 0x140   :  { %v5041_v57 = vadd.f32 %v5040_v49, %v4064_v4  ;;  %v1200_v39 = vpop.f32.mrb[1].mxu0  ;;  %v6004_v49 = vadd.f32 %v5798_v21, %v124_v8 }
 0x141   :  { %v5043_v50 = vadd.f32 %v5042_v29, %v1200_v39 }
 0x142   :  { %vm1295_vm1 = vcmp.ge.f32.partialorder %v5041_v57, 0.0  ;;  %v1311_v37 = vmul.f32 0.25, %v5041_v57 }
 0x143   :  { %vm1294_vm2 = vcmp.ge.f32.partialorder %v5043_v50, 0.0  ;;  %v1310_v11 = vmul.f32 0.25, %v5043_v50  ;;  %v4067_v31 = vpop.f32.mrb[2].mxu0 }
 0x144   :  { %v1327_v27 = vsel %vm1295_vm1, %v5041_v57, %v1311_v37  ;;  %v5045_v35 = vadd.f32 %v5044_v33, %v4067_v31  ;;  %v1212_v16 = vpop.f32.mrb[3].mxu0 }
 0x145   :  { %v1458_v36 = vand.u32 4294901760, %v1327_v27  ;;  %v1326_v29 = vsel %vm1294_vm2, %v5043_v50, %v1310_v11  ;;  %v5047_v43 = vadd.f32 %v5046_v28, %v1212_v16 }
 0x146   :  { %v1455_v4 = vand.u32 4294901760, %v1326_v29  ;;  %vm1297_vm3 = vcmp.ge.f32.partialorder %v5045_v35, 0.0  ;;  %v1313_v60 = vmul.f32 0.25, %v5045_v35 }
 0x147   :  { %v6012_v57 = vsub.f32 %v1327_v27, %v1458_v36  ;;  %vm1296_vm4 = vcmp.ge.f32.partialorder %v5047_v43, 0.0  ;;  %v1312_v51 = vmul.f32 0.25, %v5047_v43  ;;  %v4070_v1 = vpop.f32.mrb[4].mxu0 }
 0x148   :  { %v6014_v21 = vpack.c.bf16 %v1458_v36, %v1455_v4  ;;  %v6016_v59 = vsub.f32 %v1326_v29, %v1455_v4  ;;  %v1329_v50 = vsel %vm1297_vm3, %v5045_v35, %v1313_v60  ;;  %v5049_v28 = vadd.f32 %v5048_v17, %v4070_v1  ;;  %v1224_v45 = vpop.f32.mrb[5].mxu0 }
 0x149   :  { %v1464_v22 = vand.u32 4294901760, %v1329_v50  ;;  %v1328_v8 = vsel %vm1296_vm4, %v5047_v43, %v1312_v51  ;;  %v5051_v33 = vadd.f32 %v5050_v5, %v1224_v45  ;;  %v6678_v39 = vand.u32 4294901760, %v6012_v57 }
 0x14a   :  { %6738 = vst [vmem:[#allocation23_spill] sm:$0xff] %v6014_v21  ;;  %v1461_v37 = vand.u32 4294901760, %v1328_v8  ;;  %vm1299_vm5 = vcmp.ge.f32.partialorder %v5049_v28, 0.0  ;;  %v1315_v13 = vmul.f32 0.25, %v5049_v28  ;;  %4657 = vmatprep.subr.bf16.mxu1 %v6014_v21  ;;  %v6679_v11 = vand.u32 4294901760, %v6016_v59 }
 0x14b   :  { %v6021_v31 = vsub.f32 %v1329_v50, %v1464_v22  ;;  %vm1298_vm6 = vcmp.ge.f32.partialorder %v5051_v33, 0.0  ;;  %v1314_v27 = vmul.f32 0.25, %v5051_v33  ;;  %v4073_v16 = vpop.f32.mrb[6].mxu0  ;;  %4659 = vmatpush3.bf16.msra.mxu1 %v6014_v21  ;;  %v1706_v5 = vsub.f32 %v6012_v57, %v6678_v39 }
 0x14c   :  { %v6027_v17 = vpack.c.bf16 %v1464_v22, %v1461_v37  ;;  %v6029_v35 = vsub.f32 %v1328_v8, %v1461_v37  ;;  %v1331_v23 = vsel %vm1299_vm5, %v5049_v28, %v1315_v13  ;;  %v5053_v36 = vadd.f32 %v5052_v10, %v4073_v16  ;;  %v1236_v29 = vpop.f32.mrb[7].mxu0 }
 0x14d   :  { %v1470_v43 = vand.u32 4294901760, %v1331_v23  ;;  %v1330_v32 = vsel %vm1298_vm6, %v5051_v33, %v1314_v27  ;;  %v5055_v4 = vadd.f32 %v5054_v42, %v1236_v29  ;;  %v1699_v60 = vsub.f32 %v6016_v59, %v6679_v11 }
 0x14e   :  { %6739 = vst [vmem:[#allocation24_spill] sm:$0xff] %v6027_v17  ;;  %v1467_v51 = vand.u32 4294901760, %v1330_v32  ;;  %vm1301_vm7 = vcmp.ge.f32.partialorder %v5053_v36, 0.0  ;;  %v1317_v1 = vmul.f32 0.25, %v5053_v36  ;;  %4661 = vmatprep.subr.bf16.mxu1 %v6027_v17  ;;  %v1707_v50 = vand.u32 4294901760, %v1706_v5 }
 0x14f   :  { %v6035_v45 = vsub.f32 %v1331_v23, %v1470_v43  ;;  %vm1300_vm8 = vcmp.ge.f32.partialorder %v5055_v4, 0.0  ;;  %v1316_v22 = vmul.f32 0.25, %v5055_v4  ;;  %v4076_v28 = vpop.f32.mrb[8].mxu0  ;;  %4663 = vmatpush3.bf16.msra.mxu1 %v6027_v17  ;;  %v1700_v10 = vand.u32 4294901760, %v1699_v60 }
 0x150   :  { %v6038_v8 = vpack.c.bf16 %v1470_v43, %v1467_v51  ;;  %v6040_v42 = vsub.f32 %v1330_v32, %v1467_v51  ;;  %v1333_v33 = vsel %vm1301_vm7, %v5053_v36, %v1317_v1  ;;  %v5057_v37 = vadd.f32 %v5989_v52, %v4076_v28  ;;  %v1248_v13 = vpop.f32.mrb[9].mxu0 }
 0x151   :  { %v1476_v27 = vand.u32 4294901760, %v1333_v33  ;;  %v1332_v16 = vsel %vm1300_vm8, %v5055_v4, %v1316_v22  ;;  %v5059_v5 = vadd.f32 %v5992_v2, %v1248_v13  ;;  %v6044_v23 = vpack.c.bf16 %v1707_v50, %v1700_v10 }
 0x152   :  { %6740 = vst [vmem:[#allocation25_spill] sm:$0xff] %v6038_v8  ;;  %v1473_v29 = vand.u32 4294901760, %v1332_v16  ;;  %vm1303_vm9 = vcmp.ge.f32.partialorder %v5057_v37, 0.0  ;;  %v1319_v39 = vmul.f32 0.25, %v5057_v37  ;;  %4665 = vmatprep.subr.bf16.mxu1 %v6038_v8  ;;  %v6680_v43 = vand.u32 4294901760, %v6029_v35 }
 0x153   :  { %v6048_v60 = vsub.f32 %v1333_v33, %v1476_v27  ;;  %vm1302_vm10 = vcmp.ge.f32.partialorder %v5059_v5, 0.0  ;;  %v1318_v36 = vmul.f32 0.25, %v5059_v5  ;;  %v4079_v32 = vpop.f32.mrb[10].mxu0  ;;  %4667 = vmatpush3.bf16.msra.mxu1 %v6038_v8  ;;  %v6681_v52 = vand.u32 4294901760, %v6021_v31 }
 0x154   :  { %v6052_v4 = vpack.c.bf16 %v1476_v27, %v1473_v29  ;;  %v6054_v2 = vsub.f32 %v1332_v16, %v1473_v29  ;;  %v1335_v51 = vsel %vm1303_vm9, %v5057_v37, %v1319_v39  ;;  %v5061_v1 = vadd.f32 %v5995_v53, %v4079_v32  ;;  %v1260_v50 = vpop.f32.mrb[11].mxu0 }
 0x155   :  { %v1482_v22 = vand.u32 4294901760, %v1335_v51  ;;  %v1334_v28 = vsel %vm1302_vm10, %v5059_v5, %v1318_v36  ;;  %v5063_v10 = vadd.f32 %v5998_v12, %v1260_v50  ;;  %v1713_v33 = vsub.f32 %v6029_v35, %v6680_v43 }
 0x156   :  { %6741 = vst [vmem:[#allocation26_spill] sm:$0xff] %v6052_v4  ;;  %v1479_v13 = vand.u32 4294901760, %v1334_v28  ;;  %vm1305_vm11 = vcmp.ge.f32.partialorder %v5061_v1, 0.0  ;;  %v1321_v11 = vmul.f32 0.25, %v5061_v1  ;;  %4669 = vmatprep.subr.bf16.mxu1 %v6052_v4  ;;  %v1720_v39 = vsub.f32 %v6021_v31, %v6681_v52 }
 0x157   :  { %v6065_v37 = vsub.f32 %v1335_v51, %v1482_v22  ;;  %vm1304_vm12 = vcmp.ge.f32.partialorder %v5063_v10, 0.0  ;;  %v1320_v53 = vmul.f32 0.25, %v5063_v10  ;;  %v4082_v27 = vpop.f32.mrb[12].mxu0  ;;  %4671 = vmatpush3.bf16.msra.mxu1 %v6052_v4  ;;  %v1714_v12 = vand.u32 4294901760, %v1713_v33 }
 0x158   :  { %v6068_v16 = vpack.c.bf16 %v1482_v22, %v1479_v13  ;;  %v6070_v5 = vsub.f32 %v1334_v28, %v1479_v13  ;;  %v1337_v29 = vsel %vm1305_vm11, %v5061_v1, %v1321_v11  ;;  %v5065_v36 = vadd.f32 %v6001_v47, %v4082_v27  ;;  %v1272_v32 = vpop.f32.mrb[13].mxu0 }
 0x159   :  { %v1488_v50 = vand.u32 4294901760, %v1337_v29  ;;  %v1336_v43 = vsel %vm1304_vm12, %v5063_v10, %v1320_v53  ;;  %v5067_v52 = vadd.f32 %v6004_v49, %v1272_v32  ;;  %v1721_v51 = vand.u32 4294901760, %v1720_v39 }
 0x15a   :  { %6742 = vst [vmem:[#allocation27_spill] sm:$0xff] %v6068_v16  ;;  %v1485_v8 = vand.u32 4294901760, %v1336_v43  ;;  %vm1307_vm13 = vcmp.ge.f32.partialorder %v5065_v36, 0.0  ;;  %v1323_v17 = vmul.f32 0.25, %v5065_v36  ;;  %4673 = vmatprep.subr.bf16.mxu1 %v6068_v16  ;;  %v6688_v33 = vand.u32 4294901760, %v6040_v42 }
 0x15b   :  { %v6076_v22 = vsub.f32 %v1337_v29, %v1488_v50  ;;  %vm1306_vm14 = vcmp.ge.f32.partialorder %v5067_v52, 0.0  ;;  %v1322_v28 = vmul.f32 0.25, %v5067_v52  ;;  %v4085_v11 = vpop.f32.mrb[14].mxu0  ;;  %4675 = vmatpush3.bf16.msra.mxu1 %v6068_v16  ;;  %v6079_v47 = vpack.c.bf16 %v1721_v51, %v1714_v12 }
 0x15c   :  { %v6081_v1 = vpack.c.bf16 %v1488_v50, %v1485_v8  ;;  %v6083_v49 = vsub.f32 %v1336_v43, %v1485_v8  ;;  %v1339_v10 = vsel %vm1307_vm13, %v5065_v36, %v1323_v17  ;;  %v5069_v13 = vadd.f32 %v6007_v48, %v4085_v11  ;;  %v1284_v39 = vpop.f32.mrb[15].mxu0 }
 0x15d   :  { %v1494_v53 = vand.u32 4294901760, %v1339_v10  ;;  %v1338_v27 = vsel %vm1306_vm14, %v5067_v52, %v1322_v28  ;;  %v5071_v29 = vadd.f32 %v6010_v6, %v1284_v39  ;;  %v1727_v32 = vsub.f32 %v6040_v42, %v6688_v33 }
 0x15e   :  { %6743 = vst [vmem:[#allocation28_spill] sm:$0xff] %v6081_v1  ;;  %v1491_v4 = vand.u32 4294901760, %v1338_v27  ;;  %vm1309_vm15 = vcmp.ge.f32.partialorder %v5069_v13, 0.0  ;;  %v1325_v12 = vmul.f32 0.25, %v5069_v13  ;;  %4677 = vmatprep.subr.bf16.mxu1 %v6081_v1  ;;  %v6689_v8 = vand.u32 4294901760, %v6035_v45 }
 0x15f   :  { %v6092_v43 = vsub.f32 %v1339_v10, %v1494_v53  ;;  %vm1308_vm0 = vcmp.ge.f32.partialorder %v5071_v29, 0.0  ;;  %v1324_v48 = vmul.f32 0.25, %v5071_v29  ;;  %4679 = vmatpush3.bf16.msra.mxu1 %v6081_v1  ;;  %v1728_v17 = vand.u32 4294901760, %v1727_v32 }
 0x160   :  { %v6095_v52 = vpack.c.bf16 %v1494_v53, %v1491_v4  ;;  %v6097_v6 = vsub.f32 %v1338_v27, %v1491_v4  ;;  %v1341_v36 = vsel %vm1309_vm15, %v5069_v13, %v1325_v12  ;;  %v1734_v50 = vsub.f32 %v6035_v45, %v6689_v8 }
 0x161   :  { %v1500_v51 = vand.u32 4294901760, %v1341_v36  ;;  %v1340_v28 = vsel %vm1308_vm0, %v5071_v29, %v1324_v48  ;;  %v6696_v11 = vand.u32 4294901760, %v6054_v2  ;;  %v1747_v10 = vand.u32 4294901760, %v6048_v60 }
 0x162   :  { %6744 = vst [vmem:[#allocation29_spill] sm:$0xff] %v6095_v52  ;;  %v1497_v39 = vand.u32 4294901760, %v1340_v28  ;;  %4681 = vmatprep.subr.bf16.mxu1 %v6095_v52  ;;  %v1735_v33 = vand.u32 4294901760, %v1734_v50  ;;  %v1754_v53 = vand.u32 4294901760, %v6070_v5  ;;  %v1761_v4 = vand.u32 4294901760, %v6065_v37 }
 0x163   :  { %v6107_v27 = vsub.f32 %v1341_v36, %v1500_v51  ;;  %4683 = vmatpush3.bf16.msra.mxu1 %v6095_v52  ;;  %v1741_v13 = vsub.f32 %v6054_v2, %v6696_v11  ;;  %v1748_v29 = vsub.f32 %v6048_v60, %v1747_v10  ;;  %v1768_v32 = vand.u32 4294901760, %v6083_v49 }
 0x164   :  { %v6115_v12 = vpack.c.bf16 %v1500_v51, %v1497_v39  ;;  %v1795_v48 = vsub.f32 %v1340_v28, %v1497_v39  ;;  %v6117_v50 = vpack.c.bf16 %v1735_v33, %v1728_v17  ;;  %v1755_v8 = vsub.f32 %v6070_v5, %v1754_v53 }
 0x165   :  { %v1742_v1 = vand.u32 4294901760, %v1741_v13  ;;  %v1749_v36 = vand.u32 4294901760, %v1748_v29  ;;  %v1762_v16 = vsub.f32 %v6065_v37, %v1761_v4  ;;  %v1769_v52 = vsub.f32 %v6083_v49, %v1768_v32 }
 0x166   :  { %6745 = vst [vmem:[#allocation30_spill] sm:$0xff] %v6115_v12  ;;  %4685 = vmatprep.subr.bf16.mxu1 %v6115_v12  ;;  %v1756_v11 = vand.u32 4294901760, %v1755_v8  ;;  %v1775_v21 = vand.u32 4294901760, %v6076_v22  ;;  %v1782_v19 = vand.u32 4294901760, %v6097_v6  ;;  %v1789_v51 = vand.u32 4294901760, %v6092_v43 }
 0x167   :  { %4687 = vmatpush3.bf16.msra.mxu1 %v6115_v12  ;;  %v6127_v33 = vpack.c.bf16 %v1749_v36, %v1742_v1  ;;  %v1763_v17 = vand.u32 4294901760, %v1762_v16  ;;  %v1770_v28 = vand.u32 4294901760, %v1769_v52  ;;  %v1796_v39 = vand.u32 4294901760, %v1795_v48 }
 0x168   :  { %4689 = vmatprep.subr.bf16.mxu1 %v6044_v23  ;;  %v1776_v13 = vsub.f32 %v6076_v22, %v1775_v21  ;;  %v1783_v29 = vsub.f32 %v6097_v6, %v1782_v19  ;;  %v1790_v8 = vsub.f32 %v6092_v43, %v1789_v51  ;;  %v1803_v30 = vand.u32 4294901760, %v6107_v27 }
 0x169   :  { %v6134_v9 = vpack.c.bf16 %v1763_v17, %v1756_v11  ;;  %v1797_v41 = vsub.f32 %v1795_v48, %v1796_v39  ;;  %v6138_v1 = vpack.c.bf16 %v6012_v57, %v6016_v59  ;;  %v6142_v16 = vpack.c.bf16 %v6021_v31, %v6029_v35 }
 0x16a   :  { %v6746_v52 = vand.u32 4294901760, %v5898_v44  ;;  %v1777_v36 = vand.u32 4294901760, %v1776_v13  ;;  %v1784_v12 = vand.u32 4294901760, %v1783_v29  ;;  %v1791_v46 = vand.u32 4294901760, %v1790_v8 }
 0x16b   :  { %v1804_v26 = vsub.f32 %v6107_v27, %v1803_v30  ;;  %v6747_v11 = vand.u32 4294901760, %v5903_v58  ;;  %v1798_v17 = vand.u32 4294901760, %v1797_v41  ;;  %v6152_v24 = vpack.c.bf16 %v6035_v45, %v6040_v42  ;;  %v1356_v41 = vld [vmem:[%s6646_s3 + $0x70] sm:$0xff] }
 0x16c   :  { %4119 = vmatmul.mubr.f32.vlgmr.msra.gmra.mrb[16].mxu1 %v6746_v52  ;;  %v6156_v63 = vpack.c.bf16 %v6048_v60, %v6054_v2  ;;  %v6160_v44 = vpack.c.bf16 %v6065_v37, %v6070_v5  ;;  %v4708_v13 = vpack.c.bf16 %v1777_v36, %v1770_v28  ;;  %v6168_v58 = vpack.c.bf16 %v6076_v22, %v6083_v49 }
 0x16d   :  { %4691 = vmatpush3.bf16.msra.mxu1 %v6044_v23  ;;  %4121 = vmatprep.mubr.f32.mxu1 %v6747_v11  ;;  %v4712_v23 = vpack.c.bf16 %v1791_v46, %v1784_v12  ;;  %v1805_v29 = vand.u32 4294901760, %v1804_v26  ;;  %v6172_v60 = vpack.c.bf16 %v6092_v43, %v6097_v6  ;;  %v6175_v37 = vpack.c.bf16 %v6107_v27, %v1795_v48 }
 0x16e   :  { %4693 = vmatprep.subr.bf16.mxu1 %v6079_v47  ;;  %v6748_v5 = vand.u32 4294901760, %v6016_v59  ;;  %v6749_v46 = vand.u32 4294901760, %v6012_v57  ;;  %v6750_v12 = vand.u32 4294901760, %v6029_v35  ;;  %v6751_v28 = vand.u32 4294901760, %v6021_v31  ;;  %v1357_v35 = vld [vmem:[%s6646_s3 + $0x78] sm:$0xff] }
 0x16f   :  { %v6752_v22 = vand.u32 4294901760, %v5908_v3  ;;  %v4716_v49 = vpack.c.bf16 %v1805_v29, %v1798_v17  ;;  %v6753_v43 = vand.u32 4294901760, %v6040_v42  ;;  %v6754_v6 = vand.u32 4294901760, %v6035_v45 }
 0x170   :  { %v6181_v26 = vpack.c.bf16 %v6749_v46, %v6748_v5  ;;  %v6187_v8 = vpack.c.bf16 %v6751_v28, %v6750_v12  ;;  %v6755_v57 = vand.u32 4294901760, %v6054_v2  ;;  %v6201_v48 = vpack.c.bf16 %v1761_v4, %v1754_v53 }
 0x171   :  { %4122 = vmatmul.mubr.f32.gmra.mrb[18].mxu1 %v6752_v22  ;;  %v6195_v27 = vpack.c.bf16 %v6754_v6, %v6753_v43  ;;  %v6756_v31 = vand.u32 4294901760, %v5913_v18  ;;  %v6206_v3 = vand.u32 4294901760, %v1356_v41  ;;  %v6211_v45 = vpack.c.bf16 %v1775_v21, %v1768_v32  ;;  %v6767_v43 = vld [vmem:[#allocation20_spill] sm:$0xff]  ;;  %v6769_v6 = vld [vmem:[#allocation22_spill] sm:$0xff] }
 0x172   :  { %v6199_v59 = vpack.c.bf16 %v1747_v10, %v6755_v57  ;;  %4695 = vmatpush3.bf16.msra.mxu1 %v6079_v47  ;;  %v6213_v42 = vpack.c.bf16 %v1789_v51, %v1782_v19  ;;  %v6215_v2 = vpack.c.bf16 %v1803_v30, %v1796_v39  ;;  %v1609_v10 = vand.u32 4294901760, %v5953_v61  ;;  %v6773_v57 = vld [vmem:[#allocation10_spill] sm:$0xff] }
 0x173   :  { %4124 = vmatprep.mubr.f32.mxu1 %v6756_v31  ;;  %4697 = vmatprep.subr.bf16.mxu1 %v6117_v50  ;;  %v6757_v47 = vand.u32 4294901760, %v5918_v55  ;;  %v6758_v18 = vand.u32 4294901760, %v5930_v0  ;;  %v1647_v4 = vand.u32 4294901760, %v5960_v34  ;;  %v6227_v21 = vsub.f32 %v5945_v7, %v5971_v38  ;;  %v6774_v31 = vld [vmem:[#allocation24_spill] sm:$0xff] }
 0x174   :  { %v6229_v19 = vand.u32 4294901760, %v1357_v35  ;;  %v6759_v30 = vand.u32 4294901760, %v5927_v56  ;;  %v1619_v61 = vand.u32 4294901760, %v5967_v54  ;;  %v6760_v55 = vand.u32 4294901760, %v5936_v20 }
 0x175   :  { %4125 = vmatmul.mubr.f32.gmra.mrb[20].mxu1 %v6757_v47  ;;  %v1628_v53 = vsub.f32 %v5930_v0, %v6758_v18  ;;  %v1657_v51 = vand.u32 4294901760, %v5978_v40  ;;  %v6240_v39 = vsub.f32 %v1356_v41, %v6206_v3  ;;  %v1648_v56 = vsub.f32 %v5960_v34, %v1647_v4  ;;  %v6779_v47 = vld [vmem:[#allocation15_spill] sm:$0xff]  ;;  %v6780_v18 = vld [vmem:[#allocation26_spill] sm:$0xff] }
 0x176   :  { %4699 = vmatpush3.bf16.msra.mxu1 %v6117_v50  ;;  %4127 = vmatprep.mubr.f32.mxu1 %v6759_v30  ;;  %v1638_v32 = vsub.f32 %v5936_v20, %v6760_v55  ;;  %v1667_v50 = vand.u32 4294901760, %v6227_v21  ;;  %v6248_v54 = vsub.f32 %v1357_v35, %v6229_v19  ;;  %v6776_v35 = vld [vmem:[#allocation12_spill] sm:$0xff]  ;;  %v6782_v30 = vld [vmem:[#allocation19_spill] sm:$0xff] }
 0x177   :  { %4701 = vmatprep.subr.bf16.mxu1 %v6127_v33  ;;  %v1629_v7 = vand.u32 4294901760, %v1628_v53  ;;  %v1658_v36 = vsub.f32 %v5978_v40, %v1657_v51  ;;  %v1677_v11 = vand.u32 4294901760, %v6240_v39  ;;  %v1649_v17 = vand.u32 4294901760, %v1648_v56  ;;  %v6781_v53 = vld [vmem:[#allocation17_spill] sm:$0xff]  ;;  %v6784_v55 = vld [vmem:[#allocation28_spill] sm:$0xff] }
 0x178   :  { %v1639_v52 = vand.u32 4294901760, %v1638_v32  ;;  %v1668_v29 = vsub.f32 %v6227_v21, %v1667_v50  ;;  %v1687_v41 = vand.u32 4294901760, %v6248_v54  ;;  %v6785_v32 = vld [vmem:[#allocation29_spill] sm:$0xff] }
 0x179   :  { %4128 = vmatmul.mubr.f32.gmra.mrb[22].mxu1 %v1609_v10  ;;  %v1678_v5 = vsub.f32 %v6240_v39, %v1677_v11  ;;  %v6777_v10 = vld [vmem:[#allocation25_spill] sm:$0xff] }
 0x17a   :  { %4703 = vmatpush3.bf16.msra.mxu1 %v6127_v33  ;;  %4130 = vmatprep.mubr.f32.mxu1 %v1619_v61  ;;  %v1659_v33 = vand.u32 4294901760, %v1658_v36  ;;  %v1669_v46 = vand.u32 4294901760, %v1668_v29  ;;  %v1688_v12 = vsub.f32 %v6248_v54, %v1687_v41  ;;  %v6783_v61 = vld [vmem:[#allocation27_spill] sm:$0xff]  ;;  %v6789_v36 = vand.u32 4294901760, %v6773_v57 }
 0x17b   :  { %4705 = vmatprep.subr.bf16.mxu1 %v6134_v9  ;;  %v1679_v28 = vand.u32 4294901760, %v1678_v5  ;;  %v6791_v29 = vand.u32 4294901760, %v6776_v35  ;;  %v6794_v5 = vand.u32 4294901760, %v6781_v53 }
 0x17c   :  { %v1689_v22 = vand.u32 4294901760, %v1688_v12 }
 0x17d   :  { %4131 = vmatmul.mubr.f32.gmra.mrb[24].mxu1 %v1629_v7  ;;  %v6786_v7 = vld [vmem:[#allocation30_spill] sm:$0xff] }
 0x17e   :  { %4707 = vmatpush3.bf16.msra.mxu1 %v6134_v9  ;;  %4133 = vmatprep.mubr.f32.mxu1 %v1639_v52  ;;  %v6761_v9 = vld [vmem:[#allocation6_spill] sm:$0xff] }
 0x17f   :  { %4709 = vmatprep.subr.bf16.mxu1 %v4708_v13 }
 0x181   :  { %4134 = vmatmul.mubr.f32.gmra.mrb[26].mxu1 %v1649_v17 }
 0x182   :  { %4711 = vmatpush3.bf16.msra.mxu1 %v4708_v13  ;;  %4136 = vmatprep.mubr.f32.mxu1 %v1659_v33  ;;  %v6762_v13 = vld [vmem:[#allocation7_spill] sm:$0xff] }
 0x183   :  { %4713 = vmatprep.subr.bf16.mxu1 %v4712_v23 }
 0x185   :  { %4137 = vmatmul.mubr.f32.gmra.mrb[28].mxu1 %v1669_v46  ;;  %v6796_v46 = vand.u32 4294901760, %v5930_v0 }
 0x186   :  { %4715 = vmatpush3.bf16.msra.mxu1 %v4712_v23  ;;  %4139 = vmatprep.mubr.f32.mxu1 %v1679_v28  ;;  %v6763_v23 = vld [vmem:[#allocation8_spill] sm:$0xff] }
 0x187   :  { %4717 = vmatprep.subr.bf16.mxu1 %v4716_v49 }
 0x189   :  { %4140 = vmatmul.mubr.f32.gmra.mrb[30].mxu1 %v1689_v22 }
 0x18a   :  { %4719 = vmatpush3.bf16.msra.mxu1 %v4716_v49  ;;  %4174 = vmatprep.mubr.f32.mxu1 %v5755_v14  ;;  %v6765_v49 = vld [vmem:[#allocation16_spill] sm:$0xff] }
 0x18b   :  { %4721 = vmatprep.subr.bf16.mxu1 %v6138_v1 }
 0x18d   :  { %4175 = vmatmul.mubr.f32.vlgmr.msra.gmra.mrb[16].mxu1 %v5826_v25 }
 0x18e   :  { %4723 = vmatpush3.bf16.msra.mxu1 %v6138_v1  ;;  %4177 = vmatprep.mubr.f32.mxu1 %v5828_v15  ;;  %v6764_v1 = vld [vmem:[#allocation14_spill] sm:$0xff] }
 0x18f   :  { %4725 = vmatprep.subr.bf16.mxu1 %v6142_v16 }
 0x191   :  { %4178 = vmatmul.mubr.f32.gmra.mrb[18].mxu1 %v5832_v62 }
 0x192   :  { %4727 = vmatpush3.bf16.msra.mxu1 %v6142_v16  ;;  %4180 = vmatprep.mubr.f32.mxu1 %v6761_v9  ;;  %v6766_v16 = vld [vmem:[#allocation18_spill] sm:$0xff] }
 0x193   :  { %4729 = vmatprep.subr.bf16.mxu1 %v6152_v24 }
 0x195   :  { %4181 = vmatmul.mubr.f32.gmra.mrb[20].mxu1 %v6762_v13 }
 0x196   :  { %4731 = vmatpush3.bf16.msra.mxu1 %v6152_v24  ;;  %4183 = vmatprep.mubr.f32.mxu1 %v6763_v23  ;;  %v6768_v24 = vld [vmem:[#allocation21_spill] sm:$0xff] }
 0x197   :  { %4733 = vmatprep.subr.bf16.mxu1 %v6156_v63 }
 0x199   :  { %4184 = vmatmul.mubr.f32.gmra.mrb[22].mxu1 %v6764_v1 }
 0x19a   :  { %4735 = vmatpush3.bf16.msra.mxu1 %v6156_v63  ;;  %4186 = vmatprep.mubr.f32.mxu1 %v6765_v49  ;;  %v6770_v63 = vld [vmem:[#allocation5_spill] sm:$0xff] }
 0x19b   :  { %4737 = vmatprep.subr.bf16.mxu1 %v6160_v44  ;;  %v6787_v56 = vand.u32 4294901760, %v6770_v63 }
 0x19d   :  { %4187 = vmatmul.mubr.f32.gmra.mrb[24].mxu1 %v6766_v16 }
 0x19e   :  { %4739 = vmatpush3.bf16.msra.mxu1 %v6160_v44  ;;  %4189 = vmatprep.mubr.f32.mxu1 %v6767_v43  ;;  %v6771_v44 = vld [vmem:[#allocation23_spill] sm:$0xff] }
 0x19f   :  { %4741 = vmatprep.subr.bf16.mxu1 %v6168_v58 }
 0x1a1   :  { %4190 = vmatmul.mubr.f32.gmra.mrb[26].mxu1 %v6768_v24 }
 0x1a2   :  { %4743 = vmatpush3.bf16.msra.mxu1 %v6168_v58  ;;  %4192 = vmatprep.mubr.f32.mxu1 %v6769_v6  ;;  %v6772_v58 = vld [vmem:[#allocation9_spill] sm:$0xff] }
 0x1a3   :  { %4745 = vmatprep.subr.bf16.mxu1 %v6172_v60  ;;  %v6788_v52 = vand.u32 4294901760, %v6772_v58 }
 0x1a5   :  { %4193 = vmatmul.mubr.f32.gmra.mrb[28].mxu1 %v5971_v38 }
 0x1a6   :  { %4747 = vmatpush3.bf16.msra.mxu1 %v6172_v60  ;;  %4195 = vmatprep.mubr.f32.mxu1 %v6206_v3  ;;  %v6775_v60 = vld [vmem:[#allocation11_spill] sm:$0xff] }
 0x1a7   :  { %4749 = vmatprep.subr.bf16.mxu1 %v6175_v37  ;;  %v6790_v17 = vand.u32 4294901760, %v6775_v60 }
 0x1a9   :  { %4196 = vmatmul.mubr.f32.gmra.mrb[30].mxu1 %v6229_v19 }
 0x1aa   :  { %4751 = vmatpush3.bf16.msra.mxu1 %v6175_v37  ;;  %4230 = vmatprep.mubr.f32.mxu1 %v6770_v63  ;;  %v6778_v37 = vld [vmem:[#allocation13_spill] sm:$0xff] }
 0x1ab   :  { %4753 = vmatprep.subr.bf16.mxu1 %v6771_v44  ;;  %v6792_v33 = vand.u32 4294901760, %v6778_v37 }
 0x1ad   :  { %4231 = vmatmul.mubr.f32.vlgmr.msra.gmra.mrb[16].mxu1 %v6772_v58 }
 0x1ae   :  { %4755 = vmatpush3.bf16.msra.mxu1 %v6771_v44  ;;  %4233 = vmatprep.mubr.f32.mxu1 %v6773_v57 }
 0x1af   :  { %4757 = vmatprep.subr.bf16.mxu1 %v6774_v31 }
 0x1b1   :  { %4234 = vmatmul.mubr.f32.gmra.mrb[18].mxu1 %v6775_v60 }
 0x1b2   :  { %4759 = vmatpush3.bf16.msra.mxu1 %v6774_v31  ;;  %4236 = vmatprep.mubr.f32.mxu1 %v6776_v35 }
 0x1b3   :  { %4761 = vmatprep.subr.bf16.mxu1 %v6777_v10 }
 0x1b5   :  { %4237 = vmatmul.mubr.f32.gmra.mrb[20].mxu1 %v6778_v37 }
 0x1b6   :  { %4763 = vmatpush3.bf16.msra.mxu1 %v6777_v10  ;;  %4239 = vmatprep.mubr.f32.mxu1 %v6779_v47 }
 0x1b7   :  { %4765 = vmatprep.subr.bf16.mxu1 %v6780_v18 }
 0x1b9   :  { %4240 = vmatmul.mubr.f32.gmra.mrb[22].mxu1 %v6781_v53 }
 0x1ba   :  { %4767 = vmatpush3.bf16.msra.mxu1 %v6780_v18  ;;  %4242 = vmatprep.mubr.f32.mxu1 %v6782_v30 }
 0x1bb   :  { %4769 = vmatprep.subr.bf16.mxu1 %v6783_v61 }
 0x1bd   :  { %4243 = vmatmul.mubr.f32.gmra.mrb[24].mxu1 %v5930_v0  ;;  %v1377_v0 = vpop.permute.xlu0 %1376 }
 0x1be   :  { %4771 = vmatpush3.bf16.msra.mxu1 %v6783_v61  ;;  %4245 = vmatprep.mubr.f32.mxu1 %v5936_v20 }
 0x1bf   :  { %4773 = vmatprep.subr.bf16.mxu1 %v6784_v55 }
 0x1c1   :  { %4246 = vmatmul.mubr.f32.gmra.mrb[26].mxu1 %v5960_v34 }
 0x1c2   :  { %4775 = vmatpush3.bf16.msra.mxu1 %v6784_v55  ;;  %4248 = vmatprep.mubr.f32.mxu1 %v5978_v40  ;;  %v2789_v40 = vld [vmem:[%s6648_s5 + $0x8] sm:$0xff] }
 0x1c3   :  { %4777 = vmatprep.subr.bf16.mxu1 %v6785_v32 }
 0x1c5   :  { %4249 = vmatmul.mubr.f32.gmra.mrb[28].mxu1 %v6227_v21 }
 0x1c6   :  { %4779 = vmatpush3.bf16.msra.mxu1 %v6785_v32  ;;  %4251 = vmatprep.mubr.f32.mxu1 %v6240_v39 }
 0x1c7   :  { %4781 = vmatprep.subr.bf16.mxu1 %v6786_v7 }
 0x1c9   :  { %4252 = vmatmul.mubr.f32.gmra.mrb[30].mxu1 %v6248_v54 }
 0x1ca   :  { %4783 = vmatpush3.bf16.msra.mxu1 %v6786_v7  ;;  %4286 = vmatprep.mubr.f32.mxu1 %v6787_v56 }
 0x1cb   :  { %4785 = vmatprep.subr.bf16.mxu1 %v6181_v26 }
 0x1cd   :  { %4287 = vmatmul.mubr.f32.vlgmr.msra.gmra.mrb[16].mxu1 %v6788_v52 }
 0x1ce   :  { %4787 = vmatpush3.bf16.msra.mxu1 %v6181_v26  ;;  %4289 = vmatprep.mubr.f32.mxu1 %v6789_v36  ;;  %v6793_v26 = vand.u32 4294901760, %v6779_v47 }
 0x1cf   :  { %4789 = vmatprep.subr.bf16.mxu1 %v6187_v8 }
 0x1d1   :  { %4290 = vmatmul.mubr.f32.gmra.mrb[18].mxu1 %v6790_v17 }
 0x1d2   :  { %4791 = vmatpush3.bf16.msra.mxu1 %v6187_v8  ;;  %4292 = vmatprep.mubr.f32.mxu1 %v6791_v29  ;;  %v6795_v8 = vand.u32 4294901760, %v6782_v30 }
 0x1d3   :  { %4793 = vmatprep.subr.bf16.mxu1 %v6195_v27 }
 0x1d5   :  { %4293 = vmatmul.mubr.f32.gmra.mrb[20].mxu1 %v6792_v33 }
 0x1d6   :  { %4795 = vmatpush3.bf16.msra.mxu1 %v6195_v27  ;;  %4295 = vmatprep.mubr.f32.mxu1 %v6793_v26  ;;  %v6797_v27 = vand.u32 4294901760, %v5936_v20 }
 0x1d7   :  { %4797 = vmatprep.subr.bf16.mxu1 %v6199_v59 }
 0x1d9   :  { %4296 = vmatmul.mubr.f32.gmra.mrb[22].mxu1 %v6794_v5 }
 0x1da   :  { %4799 = vmatpush3.bf16.msra.mxu1 %v6199_v59  ;;  %4298 = vmatprep.mubr.f32.mxu1 %v6795_v8  ;;  %v1387_v59 = vpop.permute.xlu0 %1386 }
 0x1db   :  { %4801 = vmatprep.subr.bf16.mxu1 %v6201_v48 }
 0x1dd   :  { %4299 = vmatmul.mubr.f32.gmra.mrb[24].mxu1 %v6796_v46 }
 0x1de   :  { %4803 = vmatpush3.bf16.msra.mxu1 %v6201_v48  ;;  %4301 = vmatprep.mubr.f32.mxu1 %v6797_v27  ;;  %v6443_v48 = vand.u32 4294901760, %v2789_v40 }
 0x1df   :  { %4805 = vmatprep.subr.bf16.mxu1 %v6211_v45 }
 0x1e1   :  { %4302 = vmatmul.mubr.f32.gmra.mrb[26].mxu1 %v1647_v4 }
 0x1e2   :  { %4807 = vmatpush3.bf16.msra.mxu1 %v6211_v45  ;;  %4304 = vmatprep.mubr.f32.mxu1 %v1657_v51  ;;  %v6446_v45 = vsub.f32 %v2789_v40, %v6443_v48 }
 0x1e3   :  { %4809 = vmatprep.subr.bf16.mxu1 %v6213_v42 }
 0x1e4   :  { %v6717_v21 = vand.u32 4294901760, %v6446_v45 }
 0x1e5   :  { %4305 = vmatmul.mubr.f32.gmra.mrb[28].mxu1 %v1667_v50 }
 0x1e6   :  { %4811 = vmatpush3.bf16.msra.mxu1 %v6213_v42  ;;  %4307 = vmatprep.mubr.f32.mxu1 %v1677_v11  ;;  %v1397_v42 = vpop.permute.xlu0 %1396  ;;  %v6452_v12 = vsub.f32 %v6446_v45, %v6717_v21 }
 0x1e7   :  { %4813 = vmatprep.subr.bf16.mxu1 %v6215_v2 }
 0x1e9   :  { %4308 = vmatmul.mubr.f32.gmra.mrb[30].mxu1 %v1687_v41 }
 0x1ea   :  { %4815 = vmatpush3.bf16.msra.mxu1 %v6215_v2  ;;  %4342 = vmatprep.mubr.f32.mxu1 %v5755_v14  ;;  %v1407_v54 = vpop.permute.xlu0 %1406 }
 0x1eb   :  { %4817 = vmatprep.subr.bf16.mxu1 %v6771_v44 }
 0x1ed   :  { %4343 = vmatmul.mubr.f32.vlgmr.msra.gmra.mrb[16].mxu1 %v5826_v25 }
 0x1ee   :  { %4819 = vmatpush3.bf16.msra.mxu1 %v6771_v44  ;;  %4345 = vmatprep.mubr.f32.mxu1 %v5828_v15  ;;  %v2897_v44 = vand.u32 4294901760, %v6452_v12 }
 0x1ef   :  { %4821 = vmatprep.subr.bf16.mxu1 %v6774_v31 }
 0x1f1   :  { %4346 = vmatmul.mubr.f32.gmra.mrb[18].mxu1 %v5832_v62 }
 0x1f2   :  { %4823 = vmatpush3.bf16.msra.mxu1 %v6774_v31  ;;  %4348 = vmatprep.mubr.f32.mxu1 %v6761_v9 }
 0x1f3   :  { %4825 = vmatprep.subr.bf16.mxu1 %v6777_v10 }
 0x1f5   :  { %4349 = vmatmul.mubr.f32.gmra.mrb[20].mxu1 %v6762_v13 }
 0x1f6   :  { %4827 = vmatpush3.bf16.msra.mxu1 %v6777_v10  ;;  %4351 = vmatprep.mubr.f32.mxu1 %v6763_v23  ;;  %v1417_v10 = vpop.permute.xlu0 %1416 }
 0x1f7   :  { %4829 = vmatprep.subr.bf16.mxu1 %v6780_v18 }
 0x1f9   :  { %4352 = vmatmul.mubr.f32.gmra.mrb[22].mxu1 %v6764_v1 }
 0x1fa   :  { %4831 = vmatpush3.bf16.msra.mxu1 %v6780_v18  ;;  %4354 = vmatprep.mubr.f32.mxu1 %v6765_v49 }
 0x1fb   :  { %4833 = vmatprep.subr.bf16.mxu1 %v6783_v61 }
 0x1fd   :  { %4355 = vmatmul.mubr.f32.gmra.mrb[24].mxu1 %v6766_v16 }
 0x1fe   :  { %4835 = vmatpush3.bf16.msra.mxu1 %v6783_v61  ;;  %4357 = vmatprep.mubr.f32.mxu1 %v6767_v43 }
 0x1ff   :  { %4837 = vmatprep.subr.bf16.mxu1 %v6784_v55 }
 0x201   :  { %4358 = vmatmul.mubr.f32.gmra.mrb[26].mxu1 %v6768_v24 }
 0x202   :  { %4839 = vmatpush3.bf16.msra.mxu1 %v6784_v55  ;;  %4360 = vmatprep.mubr.f32.mxu1 %v6769_v6 }
 0x203   :  { %4841 = vmatprep.subr.bf16.mxu1 %v6785_v32 }
 0x205   :  { %4361 = vmatmul.mubr.f32.gmra.mrb[28].mxu1 %v5971_v38 }
 0x206   :  { %4843 = vmatpush3.bf16.msra.mxu1 %v6785_v32  ;;  %4363 = vmatprep.mubr.f32.mxu1 %v6206_v3 }
 0x207   :  { %4845 = vmatprep.subr.bf16.mxu1 %v6786_v7 }
 0x209   :  { %4364 = vmatmul.mubr.f32.gmra.mrb[30].mxu1 %v6229_v19 }
 0x20a   :  { %4847 = vmatpush3.bf16.msra.mxu1 %v6786_v7  ;;  %4398 = vmatprep.mubr.f32.mxu1 %v5755_v14  ;;  %v2788_v14 = vld [vmem:[%s6648_s5] sm:$0xff]  ;;  %s5275_s5 = smov [#allocation2]  }
 0x20b   :  { %v6430_v20 = vand.u32 4294901760, %v2788_v14  ;;  %s3499_s9 = sshll.u32 %s5275_s5, 4  ;;  %s3500_s9 = int_to_ptr.vmem [resolvable:$true] %s3499_s9 }
 0x20c   :  { %s5250_s10 = scalar_lea.vmem %s3500_s9, 256  ;;  %p5255_p1 = scmp.lt.s32.totalorder %s3500_s9, %s3500_s9 }
 0x20d   :  { %4399 = vmatmul.mubr.f32.vlgmr.msra.gmra.mrb[16].mxu1 %v5826_v25  ;;  %v6433_v25 = vsub.f32 %v2788_v14, %v6430_v20  ;;  %4489 = vmatprep.mubr.f32.mxu0 %v6430_v20  ;;  %p5251_p0 = scmp.ne.s32.totalorder %s3500_s9, %s5250_s10  ;;  %p5256_p2 = scmp.lt.s32.totalorder %s5250_s10, %s5250_s10 }
 0x20e   :  { %4401 = vmatprep.mubr.f32.mxu1 %v5828_v15 }
 0x20f   :  { %v2885_v15 = vand.u32 4294901760, %v6433_v25  ;;  %p5257_p3 = por %p5256_p2, %p5255_p1 }
 0x211   :  { %4402 = vmatmul.mubr.f32.gmra.mrb[18].mxu1 %v5832_v62  ;;  %v2886_v62 = vsub.f32 %v6433_v25, %v2885_v15  ;;  %p5258_p4 = pnand %p5257_p3, %p5251_p0 }
 0x212   :  { %4404 = vmatprep.mubr.f32.mxu1 %v6761_v9 }
 0x213   :  { %v2887_v34 = vand.u32 4294901760, %v2886_v62 }
 0x215   :  { %4405 = vmatmul.mubr.f32.gmra.mrb[20].mxu1 %v6762_v13 }
 0x216   :  { %4407 = vmatprep.mubr.f32.mxu1 %v6763_v23 }
 0x219   :  { %4408 = vmatmul.mubr.f32.gmra.mrb[22].mxu1 %v6764_v1 }
 0x21a   :  { %4410 = vmatprep.mubr.f32.mxu1 %v6765_v49 }
 0x21d   :  { %4411 = vmatmul.mubr.f32.gmra.mrb[24].mxu1 %v6766_v16 }
 0x21e   :  { %4413 = vmatprep.mubr.f32.mxu1 %v6767_v43 }
 0x221   :  { %4414 = vmatmul.mubr.f32.gmra.mrb[26].mxu1 %v6768_v24 }
 0x222   :  { %4416 = vmatprep.mubr.f32.mxu1 %v6769_v6 }
 0x225   :  { %4417 = vmatmul.mubr.f32.gmra.mrb[28].mxu1 %v5971_v38  ;;  %v1382_v38 = vpop.permute.xlu1 %1381 }
 0x226   :  { %4419 = vmatprep.mubr.f32.mxu1 %v6206_v3 }
 0x229   :  { %4420 = vmatmul.mubr.f32.gmra.mrb[30].mxu1 %v6229_v19  ;;  %v1392_v3 = vpop.permute.xlu1 %1391 }
 0x22a   :  { %4454 = vmatprep.mubr.f32.mxu1 %v2887_v34 }
 0x22d   :  { %v1402_v2 = vpop.permute.xlu1 %1401 }
 0x231   :  { %v1412_v28 = vpop.permute.xlu1 %1411 }
 0x235   :  { %v1422_v30 = vpop.permute.xlu1 %1421 }
 0x2e0   :  { %v4400_v4 = vpop.f32.mrb[16].mxu1 }
 0x2e1   :  { %v5072_v19 = vadd.f32 %v4400_v4, %v1382_v38  ;;  %v2646_v51 = vpop.f32.mrb[17].mxu1  ;;  %v1427_v38 = vpop.permute.xlu0 %1426 }
 0x2e2   :  { %v5073_v39 = vadd.f32 %v2646_v51, %v1377_v0 }
 0x2e3   :  { %vm2741_vm1 = vcmp.ge.f32.partialorder %v5072_v19, 0.0  ;;  %v2757_v50 = vmul.f32 0.25, %v5072_v19 }
 0x2e4   :  { %vm2740_vm2 = vcmp.ge.f32.partialorder %v5073_v39, 0.0  ;;  %v2756_v11 = vmul.f32 0.25, %v5073_v39  ;;  %v4403_v41 = vpop.f32.mrb[18].mxu1 }
 0x2e5   :  { %v2773_v22 = vsel %vm2741_vm1, %v5072_v19, %v2757_v50  ;;  %v5074_v9 = vadd.f32 %v4403_v41, %v1392_v3  ;;  %v2658_v13 = vpop.f32.mrb[19].mxu1 }
 0x2e6   :  { %v2806_v23 = vand.u32 4294901760, %v2773_v22  ;;  %v2772_v1 = vsel %vm2740_vm2, %v5073_v39, %v2756_v11  ;;  %v5075_v49 = vadd.f32 %v2658_v13, %v1387_v59 }
 0x2e7   :  { %v2803_v16 = vand.u32 4294901760, %v2772_v1  ;;  %vm2743_vm3 = vcmp.ge.f32.partialorder %v5074_v9, 0.0  ;;  %v2759_v43 = vmul.f32 0.25, %v5074_v9 }
 0x2e8   :  { %v6454_v24 = vsub.f32 %v2773_v22, %v2806_v23  ;;  %vm2742_vm4 = vcmp.ge.f32.partialorder %v5075_v49, 0.0  ;;  %v2758_v6 = vmul.f32 0.25, %v5075_v49  ;;  %v4406_v63 = vpop.f32.mrb[20].mxu1 }
 0x2e9   :  { %v6457_v58 = vpack.c.bf16 %v2806_v23, %v2803_v16  ;;  %v6459_v57 = vsub.f32 %v2772_v1, %v2803_v16  ;;  %v2775_v31 = vsel %vm2743_vm3, %v5074_v9, %v2759_v43  ;;  %v5076_v60 = vadd.f32 %v4406_v63, %v1402_v2  ;;  %v2670_v35 = vpop.f32.mrb[21].mxu1  ;;  %v1432_v2 = vpop.permute.xlu1 %1431 }
 0x2ea   :  { %v2812_v37 = vand.u32 4294901760, %v2775_v31  ;;  %v2774_v47 = vsel %vm2742_vm4, %v5075_v49, %v2758_v6  ;;  %v5077_v18 = vadd.f32 %v2670_v35, %v1397_v42  ;;  %v2913_v53 = vand.u32 4294901760, %v6454_v24  ;;  %v1437_v35 = vpop.permute.xlu0 %1436 }
 0x2eb   :  { %v2809_v61 = vand.u32 4294901760, %v2774_v47  ;;  %vm2745_vm5 = vcmp.ge.f32.partialorder %v5076_v60, 0.0  ;;  %v2761_v55 = vmul.f32 0.25, %v5076_v60  ;;  %4849 = vmatprep.subr.bf16.mxu1 %v6457_v58  ;;  %v2906_v32 = vand.u32 4294901760, %v6459_v57 }
 0x2ec   :  { %v6464_v7 = vsub.f32 %v2775_v31, %v2812_v37  ;;  %vm2744_vm6 = vcmp.ge.f32.partialorder %v5077_v18, 0.0  ;;  %v2760_v56 = vmul.f32 0.25, %v5077_v18  ;;  %v4409_v52 = vpop.f32.mrb[22].mxu1  ;;  %4851 = vmatpush3.bf16.msra.mxu1 %v6457_v58  ;;  %v2914_v36 = vsub.f32 %v6454_v24, %v2913_v53 }
 0x2ed   :  { %v6470_v17 = vpack.c.bf16 %v2812_v37, %v2809_v61  ;;  %v6472_v29 = vsub.f32 %v2774_v47, %v2809_v61  ;;  %v2777_v33 = vsel %vm2745_vm5, %v5076_v60, %v2761_v55  ;;  %v5078_v26 = vadd.f32 %v4409_v52, %v1412_v28  ;;  %v2682_v5 = vpop.f32.mrb[23].mxu1 }
 0x2ee   :  { %v2818_v8 = vand.u32 4294901760, %v2777_v33  ;;  %v2776_v46 = vsel %vm2744_vm6, %v5077_v18, %v2760_v56  ;;  %v5079_v27 = vadd.f32 %v2682_v5, %v1407_v54  ;;  %v2907_v14 = vsub.f32 %v6459_v57, %v2906_v32 }
 0x2ef   :  { %v2815_v62 = vand.u32 4294901760, %v2776_v46  ;;  %vm2747_vm7 = vcmp.ge.f32.partialorder %v5078_v26, 0.0  ;;  %v2763_v34 = vmul.f32 0.25, %v5078_v26  ;;  %4853 = vmatprep.subr.bf16.mxu1 %v6470_v17  ;;  %v2915_v0 = vand.u32 4294901760, %v2914_v36 }
 0x2f0   :  { %v6478_v40 = vsub.f32 %v2777_v33, %v2818_v8  ;;  %vm2746_vm8 = vcmp.ge.f32.partialorder %v5079_v27, 0.0  ;;  %v2762_v59 = vmul.f32 0.25, %v5079_v27  ;;  %v4412_v3 = vpop.f32.mrb[24].mxu1  ;;  %4855 = vmatpush3.bf16.msra.mxu1 %v6470_v17  ;;  %v2908_v42 = vand.u32 4294901760, %v2907_v14 }
 0x2f1   :  { %v6481_v4 = vpack.c.bf16 %v2818_v8, %v2815_v62  ;;  %v6483_v19 = vsub.f32 %v2776_v46, %v2815_v62  ;;  %v2779_v51 = vsel %vm2747_vm7, %v5078_v26, %v2763_v34  ;;  %v5080_v39 = vadd.f32 %v4412_v3, %v1422_v30  ;;  %v2694_v50 = vpop.f32.mrb[25].mxu1  ;;  %v1442_v30 = vpop.permute.xlu1 %1441 }
 0x2f2   :  { %v2824_v54 = vand.u32 4294901760, %v2779_v51  ;;  %v2778_v11 = vsel %vm2746_vm8, %v5079_v27, %v2762_v59  ;;  %v5081_v41 = vadd.f32 %v2694_v50, %v1417_v10  ;;  %v4880_v28 = vpack.c.bf16 %v2915_v0, %v2908_v42 }
 0x2f3   :  { %v2821_v22 = vand.u32 4294901760, %v2778_v11  ;;  %vm2749_vm9 = vcmp.ge.f32.partialorder %v5080_v39, 0.0  ;;  %v2765_v9 = vmul.f32 0.25, %v5080_v39  ;;  %4857 = vmatprep.subr.bf16.mxu1 %v6481_v4  ;;  %v2920_v13 = vand.u32 4294901760, %v6472_v29 }
 0x2f4   :  { %v6487_v23 = vsub.f32 %v2779_v51, %v2824_v54  ;;  %vm2748_vm10 = vcmp.ge.f32.partialorder %v5081_v41, 0.0  ;;  %v2764_v1 = vmul.f32 0.25, %v5081_v41  ;;  %4881 = vmatprep.subr.bf16.mxu0 %v4880_v28  ;;  %v4415_v49 = vpop.f32.mrb[26].mxu1  ;;  %4859 = vmatpush3.bf16.msra.mxu1 %v6481_v4  ;;  %v2927_v16 = vand.u32 4294901760, %v6464_v7  ;;  %v1447_v51 = vpop.permute.xlu0 %1446 }
 0x2f5   :  { %v6491_v43 = vpack.c.bf16 %v2824_v54, %v2821_v22  ;;  %v6493_v6 = vsub.f32 %v2778_v11, %v2821_v22  ;;  %v2781_v63 = vsel %vm2749_vm9, %v5080_v39, %v2765_v9  ;;  %v5082_v31 = vadd.f32 %v4415_v49, %v1432_v2  ;;  %4883 = vmatpush3.bf16.msra.mxu0 %v4880_v28  ;;  %v2706_v60 = vpop.f32.mrb[27].mxu1  ;;  %v1452_v11 = vpop.permute.xlu1 %1451 }
 0x2f6   :  { %v2830_v10 = vand.u32 4294901760, %v2781_v63  ;;  %v2780_v37 = vsel %vm2748_vm10, %v5081_v41, %v2764_v1  ;;  %v5083_v47 = vadd.f32 %v2706_v60, %v1427_v38  ;;  %v2921_v18 = vsub.f32 %v6472_v29, %v2920_v13 }
 0x2f7   :  { %v2827_v61 = vand.u32 4294901760, %v2780_v37  ;;  %vm2751_vm11 = vcmp.ge.f32.partialorder %v5082_v31, 0.0  ;;  %v2767_v55 = vmul.f32 0.25, %v5082_v31  ;;  %4861 = vmatprep.subr.bf16.mxu1 %v6491_v43  ;;  %v2928_v56 = vsub.f32 %v6464_v7, %v2927_v16 }
 0x2f8   :  { %v6502_v52 = vsub.f32 %v2781_v63, %v2830_v10  ;;  %vm2750_vm12 = vcmp.ge.f32.partialorder %v5083_v47, 0.0  ;;  %v2766_v36 = vmul.f32 0.25, %v5083_v47  ;;  %v2922_v33 = vand.u32 4294901760, %v2921_v18  ;;  %v4418_v26 = vpop.f32.mrb[28].mxu1  ;;  %4863 = vmatpush3.bf16.msra.mxu1 %v6491_v43 }
 0x2f9   :  { %v6505_v5 = vpack.c.bf16 %v2830_v10, %v2827_v61  ;;  %v6507_v8 = vsub.f32 %v2780_v37, %v2827_v61  ;;  %v2783_v46 = vsel %vm2751_vm11, %v5082_v31, %v2767_v55  ;;  %v2929_v27 = vand.u32 4294901760, %v2928_v56  ;;  %v2718_v14 = vpop.f32.mrb[29].mxu1 }
 0x2fa   :  { %v2836_v62 = vand.u32 4294901760, %v2783_v46  ;;  %v2782_v34 = vsel %vm2750_vm12, %v5083_v47, %v2766_v36  ;;  %v5084_v0 = vadd.f32 %v4418_v26, %v1442_v30  ;;  %v5085_v38 = vadd.f32 %v2718_v14, %v1437_v35 }
 0x2fb   :  { %v2833_v59 = vand.u32 4294901760, %v2782_v34  ;;  %v4884_v3 = vpack.c.bf16 %v2929_v27, %v2922_v33  ;;  %4865 = vmatprep.subr.bf16.mxu1 %v6505_v5  ;;  %v2934_v42 = vand.u32 4294901760, %v6483_v19  ;;  %v2941_v2 = vand.u32 4294901760, %v6478_v40 }
 0x2fc   :  { %v6512_v39 = vsub.f32 %v2783_v46, %v2836_v62  ;;  %vm2753_vm13 = vcmp.ge.f32.partialorder %v5084_v0, 0.0  ;;  %v2769_v50 = vmul.f32 0.25, %v5084_v0  ;;  %vm2752_vm14 = vcmp.ge.f32.partialorder %v5085_v38, 0.0  ;;  %v4421_v54 = vpop.f32.mrb[30].mxu1  ;;  %4867 = vmatpush3.bf16.msra.mxu1 %v6505_v5 }
 0x2fd   :  { %v6515_v41 = vpack.c.bf16 %v2836_v62, %v2833_v59  ;;  %v6517_v28 = vsub.f32 %v2782_v34, %v2833_v59  ;;  %4885 = vmatprep.subr.bf16.mxu0 %v4884_v3  ;;  %v2768_v22 = vmul.f32 0.25, %v5085_v38  ;;  %v2935_v9 = vsub.f32 %v6483_v19, %v2934_v42  ;;  %v2730_v1 = vpop.f32.mrb[31].mxu1 }
 0x2fe   :  { %v2785_v49 = vsel %vm2753_vm13, %v5084_v0, %v2769_v50  ;;  %4887 = vmatpush3.bf16.msra.mxu0 %v4884_v3  ;;  %v2942_v63 = vsub.f32 %v6478_v40, %v2941_v2  ;;  %v5086_v31 = vadd.f32 %v4421_v54, %v1452_v11  ;;  %v5087_v60 = vadd.f32 %v2730_v1, %v1447_v51 }
 0x2ff   :  { %v2842_v35 = vand.u32 4294901760, %v2785_v49  ;;  %v2784_v10 = vsel %vm2752_vm14, %v5085_v38, %v2768_v22  ;;  %v2936_v37 = vand.u32 4294901760, %v2935_v9  ;;  %4869 = vmatprep.subr.bf16.mxu1 %v6515_v41  ;;  %v2948_v47 = vand.u32 4294901760, %v6493_v6 }
 0x300   :  { %v2839_v18 = vand.u32 4294901760, %v2784_v10  ;;  %v2943_v30 = vand.u32 4294901760, %v2942_v63  ;;  %vm2755_vm15 = vcmp.ge.f32.partialorder %v5086_v31, 0.0  ;;  %v2771_v61 = vmul.f32 0.25, %v5086_v31  ;;  %4871 = vmatpush3.bf16.msra.mxu1 %v6515_v41 }
 0x301   :  { %v6529_v55 = vsub.f32 %v2785_v49, %v2842_v35  ;;  %vm2754_vm0 = vcmp.ge.f32.partialorder %v5087_v60, 0.0  ;;  %v2770_v56 = vmul.f32 0.25, %v5087_v60  ;;  %v2949_v36 = vsub.f32 %v6493_v6, %v2948_v47 }
 0x302   :  { %v6534_v33 = vpack.c.bf16 %v2842_v35, %v2839_v18  ;;  %v6536_v26 = vsub.f32 %v2784_v10, %v2839_v18  ;;  %v4888_v46 = vpack.c.bf16 %v2943_v30, %v2936_v37  ;;  %v2787_v27 = vsel %vm2755_vm15, %v5086_v31, %v2771_v61 }
 0x303   :  { %v2848_v14 = vand.u32 4294901760, %v2787_v27  ;;  %v2786_v62 = vsel %vm2754_vm0, %v5087_v60, %v2770_v56  ;;  %v2950_v34 = vand.u32 4294901760, %v2949_v36  ;;  %v2955_v0 = vand.u32 4294901760, %v6487_v23 }
 0x304   :  { %4889 = vmatprep.subr.bf16.mxu0 %v4888_v46  ;;  %v2845_v38 = vand.u32 4294901760, %v2786_v62  ;;  %4873 = vmatprep.subr.bf16.mxu1 %v6534_v33  ;;  %v2962_v59 = vand.u32 4294901760, %v6507_v8  ;;  %v2969_v3 = vand.u32 4294901760, %v6502_v52  ;;  %v2976_v51 = vand.u32 4294901760, %v6517_v28 }
 0x305   :  { %v3010_v50 = vsub.f32 %v2787_v27, %v2848_v14  ;;  %4891 = vmatpush3.bf16.msra.mxu0 %v4888_v46  ;;  %v2956_v54 = vsub.f32 %v6487_v23, %v2955_v0  ;;  %4875 = vmatpush3.bf16.msra.mxu1 %v6534_v33  ;;  %v2983_v11 = vand.u32 4294901760, %v6512_v39  ;;  %v2990_v22 = vand.u32 4294901760, %v6536_v26 }
 0x306   :  { %v6547_v9 = vpack.c.bf16 %v2848_v14, %v2845_v38  ;;  %v3003_v1 = vsub.f32 %v2786_v62, %v2845_v38  ;;  %v2963_v49 = vsub.f32 %v6507_v8, %v2962_v59  ;;  %v2970_v63 = vsub.f32 %v6502_v52, %v2969_v3 }
 0x307   :  { %v2957_v31 = vand.u32 4294901760, %v2956_v54  ;;  %v2977_v60 = vsub.f32 %v6517_v28, %v2976_v51  ;;  %v2984_v35 = vsub.f32 %v6512_v39, %v2983_v11  ;;  %v2991_v10 = vsub.f32 %v6536_v26, %v2990_v22 }
 0x308   :  { %v2964_v37 = vand.u32 4294901760, %v2963_v49  ;;  %v2971_v18 = vand.u32 4294901760, %v2970_v63  ;;  %4877 = vmatprep.subr.bf16.mxu1 %v6547_v9  ;;  %v2997_v30 = vand.u32 4294901760, %v6529_v55  ;;  %v3004_v61 = vand.u32 4294901760, %v3003_v1 }
 0x309   :  { %v4892_v56 = vpack.c.bf16 %v2957_v31, %v2950_v34  ;;  %v2978_v36 = vand.u32 4294901760, %v2977_v60  ;;  %v2985_v46 = vand.u32 4294901760, %v2984_v35  ;;  %4879 = vmatpush3.bf16.msra.mxu1 %v6547_v9  ;;  %v2992_v27 = vand.u32 4294901760, %v2991_v10 }
 0x30a   :  { %v4896_v14 = vpack.c.bf16 %v2971_v18, %v2964_v37  ;;  %v2998_v62 = vsub.f32 %v6529_v55, %v2997_v30  ;;  %v3005_v38 = vsub.f32 %v3003_v1, %v3004_v61  ;;  %v3011_v54 = vand.u32 4294901760, %v3010_v50 }
 0x30b   :  { %4893 = vmatprep.subr.bf16.mxu0 %v4892_v56  ;;  %v4900_v21 = vpack.c.bf16 %v2985_v46, %v2978_v36  ;;  %v4912_v49 = vpack.c.bf16 %v6454_v24, %v6459_v57  ;;  %v4916_v63 = vpack.c.bf16 %v6464_v7, %v6472_v29  ;;  %v4920_v34 = vpack.c.bf16 %v6478_v40, %v6483_v19 }
 0x30c   :  { %4895 = vmatpush3.bf16.msra.mxu0 %v4892_v56  ;;  %4455 = vmatmul.mubr.f32.vlgmr.msra.gmra.mrb[32].mxu1 %v2897_v44  ;;  %v2999_v31 = vand.u32 4294901760, %v2998_v62  ;;  %v3006_v60 = vand.u32 4294901760, %v3005_v38  ;;  %v3012_v35 = vsub.f32 %v3010_v50, %v3011_v54  ;;  %v4924_v10 = vpack.c.bf16 %v6487_v23, %v6493_v6 }
 0x30d   :  { %4897 = vmatprep.subr.bf16.mxu0 %v4896_v14  ;;  %v4928_v37 = vpack.c.bf16 %v6502_v52, %v6507_v8  ;;  %v4932_v18 = vpack.c.bf16 %v6512_v39, %v6517_v28  ;;  %v4936_v36 = vpack.c.bf16 %v6529_v55, %v6536_v26  ;;  %v4940_v56 = vpack.c.bf16 %v3010_v50, %v3003_v1 }
 0x30e   :  { %v4904_v46 = vpack.c.bf16 %v2999_v31, %v2992_v27  ;;  %v3013_v12 = vand.u32 4294901760, %v3012_v35  ;;  %v4976_v44 = vpack.c.bf16 %v2913_v53, %v2906_v32  ;;  %v4980_v23 = vpack.c.bf16 %v2927_v16, %v2920_v13 }
 0x30f   :  { %v4984_v52 = vpack.c.bf16 %v2941_v2, %v2934_v42  ;;  %v4988_v8 = vpack.c.bf16 %v2955_v0, %v2948_v47  ;;  %v4992_v39 = vpack.c.bf16 %v2969_v3, %v2962_v59  ;;  %v4996_v28 = vpack.c.bf16 %v2983_v11, %v2976_v51 }
 0x310   :  { %4899 = vmatpush3.bf16.msra.mxu0 %v4896_v14  ;;  %v4908_v57 = vpack.c.bf16 %v3013_v12, %v3006_v60  ;;  %v5000_v55 = vpack.c.bf16 %v2997_v30, %v2990_v22  ;;  %v5004_v24 = vpack.c.bf16 %v3011_v54, %v3004_v61 }
 0x311   :  { %4901 = vmatprep.subr.bf16.mxu0 %v4900_v21 }
 0x314   :  { %4903 = vmatpush3.bf16.msra.mxu0 %v4900_v21  ;;  %v2795_v21 = vpop.permute.xlu0 %2794 }
 0x315   :  { %4905 = vmatprep.subr.bf16.mxu0 %v4904_v46 }
 0x318   :  { %4907 = vmatpush3.bf16.msra.mxu0 %v4904_v46 }
 0x319   :  { %4909 = vmatprep.subr.bf16.mxu0 %v4908_v57 }
 0x31c   :  { %4911 = vmatpush3.bf16.msra.mxu0 %v4908_v57 }
 0x31d   :  { %4913 = vmatprep.subr.bf16.mxu0 %v4912_v49 }
 0x31f   :  { %4490 = vmatmul.mubr.f32.vlgmr.msra.gmra.mrb[16].mxu0 %v6443_v48 }
 0x320   :  { %4915 = vmatpush3.bf16.msra.mxu0 %v4912_v49  ;;  %4524 = vmatprep.mubr.f32.mxu0 %v6433_v25  ;;  %v6798_v25 = vand.u32 4294901760, %v6446_v45 }
 0x321   :  { %4917 = vmatprep.subr.bf16.mxu0 %v4916_v63 }
 0x324   :  { %4919 = vmatpush3.bf16.msra.mxu0 %v4916_v63 }
 0x325   :  { %4921 = vmatprep.subr.bf16.mxu0 %v4920_v34 }
 0x328   :  { %4923 = vmatpush3.bf16.msra.mxu0 %v4920_v34 }
 0x329   :  { %4925 = vmatprep.subr.bf16.mxu0 %v4924_v10 }
 0x32c   :  { %4927 = vmatpush3.bf16.msra.mxu0 %v4924_v10 }
 0x32d   :  { %4929 = vmatprep.subr.bf16.mxu0 %v4928_v37 }
 0x330   :  { %4931 = vmatpush3.bf16.msra.mxu0 %v4928_v37 }
 0x331   :  { %4933 = vmatprep.subr.bf16.mxu0 %v4932_v18 }
 0x334   :  { %4935 = vmatpush3.bf16.msra.mxu0 %v4932_v18 }
 0x335   :  { %4937 = vmatprep.subr.bf16.mxu0 %v4936_v36 }
 0x338   :  { %4939 = vmatpush3.bf16.msra.mxu0 %v4936_v36 }
 0x339   :  { %4941 = vmatprep.subr.bf16.mxu0 %v4940_v56 }
 0x33c   :  { %4943 = vmatpush3.bf16.msra.mxu0 %v4940_v56 }
 0x33d   :  { %4945 = vmatprep.subr.bf16.mxu0 %v6457_v58 }
 0x33f   :  { %4525 = vmatmul.mubr.f32.vlgmr.msra.gmra.mrb[16].mxu0 %v6446_v45  ;;  %v2800_v45 = vpop.permute.xlu1 %2799 }
 0x340   :  { %4947 = vmatpush3.bf16.msra.mxu0 %v6457_v58  ;;  %4559 = vmatprep.mubr.f32.mxu0 %v2885_v15 }
 0x341   :  { %4949 = vmatprep.subr.bf16.mxu0 %v6470_v17 }
 0x344   :  { %4951 = vmatpush3.bf16.msra.mxu0 %v6470_v17 }
 0x345   :  { %4953 = vmatprep.subr.bf16.mxu0 %v6481_v4 }
 0x348   :  { %4955 = vmatpush3.bf16.msra.mxu0 %v6481_v4 }
 0x349   :  { %4957 = vmatprep.subr.bf16.mxu0 %v6491_v43 }
 0x34c   :  { %4959 = vmatpush3.bf16.msra.mxu0 %v6491_v43 }
 0x34d   :  { %4961 = vmatprep.subr.bf16.mxu0 %v6505_v5 }
 0x350   :  { %4963 = vmatpush3.bf16.msra.mxu0 %v6505_v5 }
 0x351   :  { %4965 = vmatprep.subr.bf16.mxu0 %v6515_v41 }
 0x354   :  { %4967 = vmatpush3.bf16.msra.mxu0 %v6515_v41 }
 0x355   :  { %4969 = vmatprep.subr.bf16.mxu0 %v6534_v33 }
 0x358   :  { %4971 = vmatpush3.bf16.msra.mxu0 %v6534_v33 }
 0x359   :  { %4973 = vmatprep.subr.bf16.mxu0 %v6547_v9 }
 0x35c   :  { %4975 = vmatpush3.bf16.msra.mxu0 %v6547_v9 }
 0x35d   :  { %4977 = vmatprep.subr.bf16.mxu0 %v4976_v44 }
 0x35f   :  { %4560 = vmatmul.mubr.f32.vlgmr.msra.gmra.mrb[16].mxu0 %v6798_v25 }
 0x360   :  { %4979 = vmatpush3.bf16.msra.mxu0 %v4976_v44  ;;  %4594 = vmatprep.mubr.f32.mxu0 %v6430_v20 }
 0x361   :  { %4981 = vmatprep.subr.bf16.mxu0 %v4980_v23 }
 0x364   :  { %4983 = vmatpush3.bf16.msra.mxu0 %v4980_v23 }
 0x365   :  { %4985 = vmatprep.subr.bf16.mxu0 %v4984_v52 }
 0x368   :  { %4987 = vmatpush3.bf16.msra.mxu0 %v4984_v52 }
 0x369   :  { %4989 = vmatprep.subr.bf16.mxu0 %v4988_v8 }
 0x36c   :  { %4991 = vmatpush3.bf16.msra.mxu0 %v4988_v8 }
 0x36d   :  { %4993 = vmatprep.subr.bf16.mxu0 %v4992_v39 }
 0x370   :  { %4995 = vmatpush3.bf16.msra.mxu0 %v4992_v39 }
 0x371   :  { %4997 = vmatprep.subr.bf16.mxu0 %v4996_v28 }
 0x374   :  { %4999 = vmatpush3.bf16.msra.mxu0 %v4996_v28 }
 0x375   :  { %5001 = vmatprep.subr.bf16.mxu0 %v5000_v55 }
 0x378   :  { %5003 = vmatpush3.bf16.msra.mxu0 %v5000_v55 }
 0x379   :  { %5005 = vmatprep.subr.bf16.mxu0 %v5004_v24 }
 0x37c   :  { %5007 = vmatpush3.bf16.msra.mxu0 %v5004_v24 }
 0x37d   :  { %5009 = vmatprep.subr.bf16.mxu0 %v6457_v58 }
 0x37f   :  { %4595 = vmatmul.mubr.f32.vlgmr.msra.gmra.mrb[16].mxu0 %v6443_v48 }
 0x380   :  { %5011 = vmatpush3.bf16.msra.mxu0 %v6457_v58  ;;  %4629 = vmatprep.mubr.f32.mxu0 %v6430_v20 }
 0x381   :  { %5013 = vmatprep.subr.bf16.mxu0 %v6470_v17 }
 0x384   :  { %5015 = vmatpush3.bf16.msra.mxu0 %v6470_v17 }
 0x385   :  { %5017 = vmatprep.subr.bf16.mxu0 %v6481_v4 }
 0x388   :  { %5019 = vmatpush3.bf16.msra.mxu0 %v6481_v4 }
 0x389   :  { %5021 = vmatprep.subr.bf16.mxu0 %v6491_v43 }
 0x38c   :  { %5023 = vmatpush3.bf16.msra.mxu0 %v6491_v43 }
 0x38d   :  { %5025 = vmatprep.subr.bf16.mxu0 %v6505_v5 }
 0x390   :  { %5027 = vmatpush3.bf16.msra.mxu0 %v6505_v5 }
 0x391   :  { %5029 = vmatprep.subr.bf16.mxu0 %v6515_v41 }
 0x394   :  { %5031 = vmatpush3.bf16.msra.mxu0 %v6515_v41 }
 0x395   :  { %5033 = vmatprep.subr.bf16.mxu0 %v6534_v33 }
 0x398   :  { %5035 = vmatpush3.bf16.msra.mxu0 %v6534_v33 }
 0x399   :  { %5037 = vmatprep.subr.bf16.mxu0 %v6547_v9 }
 0x39c   :  { %5039 = vmatpush3.bf16.msra.mxu0 %v6547_v9 }
 0x39f   :  { %4630 = vmatmul.mubr.f32.vlgmr.msra.gmra.mrb[16].mxu0 %v6443_v48 }
 0x3df   :  { %v4456_v20 = vpop.f32.mrb[32].mxu1 }
 0x3e0   :  { %v2889_v15 = vpop.f32.mrb[33].mxu1  ;;  %v2900_v58 = vadd.f32 %v4456_v20, %v2800_v45 }
 0x3e1   :  { %v2890_v53 = vadd.f32 %v2889_v15, %v2795_v21 }
 0x472   :  { %v4631_v32 = vpop.f32.mrb[16].mxu0 }
 0x473   :  { %v5089_v7 = vadd.f32 %v4631_v32, %v2900_v58  ;;  %v3476_v17 = vpop.f32.mrb[17].mxu0 }
 0x474   :  { %v5091_v29 = vadd.f32 %v3476_v17, %v2890_v53 }
 0x475   :  { %vm3487_vm1 = vcmp.ge.f32.partialorder %v5089_v7, 0.0  ;;  %v3489_v40 = vmul.f32 0.25, %v5089_v7 }
 0x476   :  { %vm3486_vm2 = vcmp.ge.f32.partialorder %v5091_v29, 0.0  ;;  %v3488_v4 = vmul.f32 0.25, %v5091_v29 }
 0x477   :  { %v3491_v19 = vsel %vm3487_vm1, %v5089_v7, %v3489_v40 }
 0x478   :  { %3493 = vst [vmem:[#allocation2 + $0x8] sm:$0xff] %v3491_v19  ;;  %v3490_v48 = vsel %vm3486_vm2, %v5091_v29, %v3488_v4 }
 0x479   :  { %3492 = vst [vmem:[#allocation2] sm:$0xff] %v3490_v48 }
 0x47a   :  { %5261 = shalt.err (!%p5258_p4)
}
 0x47b   :  { %s5262_s0 = scalar_lea.hbm %s6650_s7, 256 }
 0x47c   :  { %p5263_p5 = scmp.ne.s32.totalorder %s6650_s7, %s5262_s0  ;;  %p5266_p6 = scmp.lt.u32.totalorder %s5262_s0, %s6650_s7 }
 0x47e   :  { %p5268_p7 = pnand %p5266_p6, %p5263_p5 }
 0x480   :  { %5271 = shalt.err (!%p5268_p7)
}
 0x481   :  { %s5276_s17 = smov 128   ;;  %s5277_s18 = smov 8  }
 0x482   :  { %3505 = dma.vmem_to_hbm [thread:$0]  %s3500_s9, 256, %s6650_s7, [#allocation3], %s5276_s17, %s5276_s17, %s5277_s18  }
 0x483   :  { %5272 = dma.done.wait [#allocation3], 256  }
 0x484   :  { %5273 = vsyncadd [#allocation3], 4294967040 }
 0x485   :  { %3509 = vsyncpa [#allocation3], 1 }

</bundles_post_ra>
